<compile_context>
chip_gen: v7x
topology: tpu7x:2x2x1
jax: 0.10.0
libtpu: 0.0.40
codegen_flags: <defaults>
</compile_context>

<pallas_src>
import numpy as np
import jax
import jax.numpy as jnp
from jax import lax
from jax.experimental import pallas as pl
from jax.experimental.pallas import tpu as pltpu

# bmoes tag scheme: span2id = {'B':0, 'M':1, 'O':2, 'E':3, 'S':4}
B_ID = 0
E_ID = 3
NUM_SPAN = 5
NUM_ATTR = 4
HEAD_PAD = 128          # lane-dense padded head width; sliced back in the wrapper
VMEM_LIMIT = 48 * 1024 * 1024   # keep headroom on v7x (64 MiB physical per TC)


def _sigmoid(x):
    # one EUP push (tanh) + VPU mul/add instead of exp + reciprocal
    return 0.5 * jnp.tanh(0.5 * x) + 0.5


def _pick_batch_tile(Bb, cap=8):
    if Bb <= cap:
        return Bb
    if Bb % cap == 0:
        return cap
    return Bb  # fall back to whole batch if it doesn't tile evenly


# ----------------------------------------------------------------------------
# Kernel 1: bidirectional single-layer LSTM with fused mlp_span epilogue.
#   x_tm (S,B,H) time-major -> padded span logits (S,B,HEAD_PAD);  Hh = H // 2.
# ----------------------------------------------------------------------------
def run_bilstm_span(x_tm, wih_cat, whh_f_t, whh_b_t, bias_cat,
                    ws_f_pad, ws_b_pad, b_span_pad, *, batch_tile=None):
    S, Bb, H = x_tm.shape
    Hh = H // 2
    G4 = 4 * Hh
    NP = ws_f_pad.shape[1]
    Bt = batch_tile or _pick_batch_tile(Bb)
    unroll = True if S <= 32 else 4

    def kernel(x_ref, wih_ref, whhf_ref, whhb_ref, bias_ref,
               wsf_ref, wsb_ref, bs_ref, out_ref,
               gxf_scr, gxb_scr, hsf_scr, hsb_scr):
        # ---- hoisted input projection: one big MXU matmul, bias folded ----
        x2 = x_ref[...].reshape(S * Bt, H)
        gx = jnp.dot(x2, wih_ref[...],
                     preferred_element_type=jnp.float32) + bias_ref[...]
        gxf_scr[...] = gx[:, :G4].reshape(S, Bt, G4)
        gxb_scr[...] = gx[:, G4:].reshape(S, Bt, G4)

        whh_f = whhf_ref[...]
        whh_b = whhb_ref[...]

        def step(t, carry):
            h_f, c_f, h_b, c_b = carry          # (Bt, Hh) each, vreg-resident
            tb = S - 1 - t

            gf = gxf_scr[t] + jnp.dot(h_f, whh_f,
                                      preferred_element_type=jnp.float32)
            gb = gxb_scr[tb] + jnp.dot(h_b, whh_b,
                                       preferred_element_type=jnp.float32)

            # forward direction (PyTorch gate order i, f, g, o)
            i_f = _sigmoid(gf[:, 0 * Hh:1 * Hh])
            f_f = _sigmoid(gf[:, 1 * Hh:2 * Hh])
            g_f = jnp.tanh(gf[:, 2 * Hh:3 * Hh])
            o_f = _sigmoid(gf[:, 3 * Hh:4 * Hh])
            c_f = f_f * c_f + i_f * g_f
            h_f = o_f * jnp.tanh(c_f)

            # backward direction
            i_b = _sigmoid(gb[:, 0 * Hh:1 * Hh])
            f_b = _sigmoid(gb[:, 1 * Hh:2 * Hh])
            g_b = jnp.tanh(gb[:, 2 * Hh:3 * Hh])
            o_b = _sigmoid(gb[:, 3 * Hh:4 * Hh])
            c_b = f_b * c_b + i_b * g_b
            h_b = o_b * jnp.tanh(c_b)

            hsf_scr[t] = h_f
            hsb_scr[tb] = h_b
            return (h_f, c_f, h_b, c_b)

        zero = jnp.zeros((Bt, Hh), jnp.float32)
        lax.fori_loop(0, S, step, (zero, zero, zero, zero), unroll=unroll)

        # ---- fused mlp_span epilogue: split-weight matmuls, no concatenate ----
        hf = hsf_scr[...].reshape(S * Bt, Hh)
        hb = hsb_scr[...].reshape(S * Bt, Hh)
        logits = (jnp.dot(hf, wsf_ref[...], preferred_element_type=jnp.float32)
                  + jnp.dot(hb, wsb_ref[...], preferred_element_type=jnp.float32)
                  + bs_ref[...])
        out_ref[...] = logits.reshape(S, Bt, NP)

    grid = (pl.cdiv(Bb, Bt),)
    return pl.pallas_call(
        kernel,
        out_shape=jax.ShapeDtypeStruct((S, Bb, NP), jnp.float32),
        grid=grid,
        in_specs=[
            pl.BlockSpec((S, Bt, H), lambda i: (0, i, 0)),
            pl.BlockSpec((H, 8 * Hh), lambda i: (0, 0)),
            pl.BlockSpec((Hh, G4), lambda i: (0, 0)),
            pl.BlockSpec((Hh, G4), lambda i: (0, 0)),
            pl.BlockSpec((1, 8 * Hh), lambda i: (0, 0)),
            pl.BlockSpec((Hh, NP), lambda i: (0, 0)),
            pl.BlockSpec((Hh, NP), lambda i: (0, 0)),
            pl.BlockSpec((1, NP), lambda i: (0, 0)),
        ],
        out_specs=pl.BlockSpec((S, Bt, NP), lambda i: (0, i, 0)),
        scratch_shapes=[
            pltpu.VMEM((S, Bt, G4), jnp.float32),   # fwd input-gate projections
            pltpu.VMEM((S, Bt, G4), jnp.float32),   # bwd input-gate projections
            pltpu.VMEM((S, Bt, Hh), jnp.float32),   # fwd hidden states (time-major)
            pltpu.VMEM((S, Bt, Hh), jnp.float32),   # bwd hidden states (time-major)
        ],
        compiler_params=pltpu.CompilerParams(
            dimension_semantics=("parallel",),
            vmem_limit_bytes=VMEM_LIMIT),
    )(x_tm, wih_cat, whh_f_t, whh_b_t, bias_cat, ws_f_pad, ws_b_pad, b_span_pad)


# ----------------------------------------------------------------------------
# Kernel 2: tail segment-mean pooling expressed as one selection/mean matmul,
# fused with mlp_attr.  pool_mat (B,S,S) built once in JAX from span_labels.
#   pooled = P @ x ; logits = pooled @ W_attr + b   -> (B,S,HEAD_PAD)
# ----------------------------------------------------------------------------
def run_attr_tail(pool_mat, attr_hid, w_attr_pad, b_attr_pad, *, batch_tile=None):
    Bb, S, H = attr_hid.shape
    NP = w_attr_pad.shape[1]
    Bt = batch_tile or _pick_batch_tile(Bb)

    def kernel(p_ref, x_ref, w_ref, b_ref, out_ref):
        pooled = jnp.einsum('bjs,bsh->bjh', p_ref[...], x_ref[...],
                            preferred_element_type=jnp.float32)
        flat = pooled.reshape(Bt * S, H)
        logits = (jnp.dot(flat, w_ref[...], preferred_element_type=jnp.float32)
                  + b_ref[...])
        out_ref[...] = logits.reshape(Bt, S, NP)

    grid = (pl.cdiv(Bb, Bt),)
    return pl.pallas_call(
        kernel,
        out_shape=jax.ShapeDtypeStruct((Bb, S, NP), jnp.float32),
        grid=grid,
        in_specs=[
            pl.BlockSpec((Bt, S, S), lambda i: (i, 0, 0)),
            pl.BlockSpec((Bt, S, H), lambda i: (i, 0, 0)),
            pl.BlockSpec((H, NP), lambda i: (0, 0)),
            pl.BlockSpec((1, NP), lambda i: (0, 0)),
        ],
        out_specs=pl.BlockSpec((Bt, S, NP), lambda i: (i, 0, 0)),
        compiler_params=pltpu.CompilerParams(
            dimension_semantics=("parallel",),
            vmem_limit_bytes=VMEM_LIMIT),
    )(pool_mat, attr_hid, w_attr_pad, b_attr_pad)


# ----------------------------------------------------------------------------
# Pooling-matrix construction (pure JAX, cheap index math on span_labels).
# spos carries across batch rows exactly like the torch double loop.
# ----------------------------------------------------------------------------
def build_pool_matrix(span_labels):
    lab = span_labels.astype(jnp.int32)
    Bb, S = lab.shape
    flat = lab.reshape(-1)
    q = jnp.arange(Bb * S, dtype=jnp.int32)
    last_b_flat = lax.cummax(jnp.where(flat == B_ID, q, -1), axis=0)
    spos = jnp.where(last_b_flat >= 0, last_b_flat % S, -1).reshape(Bb, S)

    j = jnp.arange(S, dtype=jnp.int32)[None, :, None]        # (1,S,1) out row
    k = jnp.arange(S, dtype=jnp.int32)[None, None, :]        # (1,1,S) in row
    sp = spos[:, :, None]                                     # (B,S,1)
    in_seg = (k >= sp) & (k <= j) & (sp >= 0)
    cnt = jnp.maximum(j - sp + 1, 1).astype(jnp.float32)
    mean_row = in_seg.astype(jnp.float32) / cnt
    ident = (k == j).astype(jnp.float32)
    use_mean = (lab == E_ID)[:, :, None] & (sp >= 0)
    return jnp.where(use_mean, mean_row, ident)               # (B,S,S) f32


# ----------------------------------------------------------------------------
# Host-side parameter preparation (pre-transpose / split / pad; done ONCE)
# ----------------------------------------------------------------------------
def prepare_params(p):
    Hh = p['whh_f'].shape[1]
    wih_cat = jnp.concatenate([p['wih_f'].T, p['wih_b'].T], axis=1)   # (H, 8Hh)
    whh_f_t = jnp.asarray(p['whh_f'].T)                               # (Hh, 4Hh)
    whh_b_t = jnp.asarray(p['whh_b'].T)                               # (Hh, 4Hh)
    bias_cat = jnp.concatenate([p['b_f'], p['b_b']], axis=1)          # (1, 8Hh)

    def pad_head(w, b):  # w (N, D), b (1, N) -> (D, HEAD_PAD), (1, HEAD_PAD)
        N, D = w.shape
        wt = jnp.zeros((D, HEAD_PAD), jnp.float32).at[:, :N].set(w.T)
        bp = jnp.zeros((1, HEAD_PAD), jnp.float32).at[:, :N].set(b)
        return wt, bp

    w_span_pad, b_span_pad = pad_head(p['w_span'], p['b_span'])       # (2Hh,128)
    ws_f_pad = w_span_pad[:Hh]                                        # applied to h_f
    ws_b_pad = w_span_pad[Hh:]                                        # applied to h_b
    w_attr_pad, b_attr_pad = pad_head(p['w_attr'], p['b_attr'])
    return dict(wih_cat=wih_cat, whh_f_t=whh_f_t, whh_b_t=whh_b_t,
                bias_cat=bias_cat, ws_f_pad=ws_f_pad, ws_b_pad=ws_b_pad,
                b_span_pad=b_span_pad, w_attr_pad=w_attr_pad,
                b_attr_pad=b_attr_pad)


def forward(prep, span_labels, seqs_hiddens):
    """Forward of BILSTM_CRF_Span_Attr_Tail (eval mode; dropout = identity)."""
    # span path: BiLSTM + fused mlp_span (span_use_lstm=True); time-major in/out
    x_tm = jnp.transpose(seqs_hiddens, (1, 0, 2))              # (S, B, H)
    logits_span_tm = run_bilstm_span(
        x_tm, prep['wih_cat'], prep['whh_f_t'], prep['whh_b_t'],
        prep['bias_cat'], prep['ws_f_pad'], prep['ws_b_pad'], prep['b_span_pad'])
    logits_span = jnp.transpose(logits_span_tm, (1, 0, 2))[:, :, :NUM_SPAN]

    # attr path: encoder hiddens (attr_use_lstm=False) + tail pooling + mlp_attr
    pool_mat = build_pool_matrix(span_labels)
    logits_attr_pad = run_attr_tail(
        pool_mat, seqs_hiddens, prep['w_attr_pad'], prep['b_attr_pad'])
    return logits_span, logits_attr_pad[:, :, :NUM_ATTR]


# ----------------------------------------------------------------------------
# Pure numpy reference (for correctness check)
# ----------------------------------------------------------------------------
def _ref_forward(params, span_labels, x):
    xn = np.asarray(x, np.float64)
    Bb, S, H = xn.shape

    def lstm_dir(wih, whh, b, reverse):
        wih = np.asarray(wih, np.float64)
        whh = np.asarray(whh, np.float64)
        b = np.asarray(b, np.float64)
        Hh = whh.shape[1]
        h = np.zeros((Bb, Hh)); c = np.zeros((Bb, Hh))
        out = np.zeros((Bb, S, Hh))
        order = range(S - 1, -1, -1) if reverse else range(S)
        for t in order:
            g = xn[:, t] @ wih.T + h @ whh.T + b
            i = 1.0 / (1.0 + np.exp(-g[:, :Hh]))
            f = 1.0 / (1.0 + np.exp(-g[:, Hh:2 * Hh]))
            gg = np.tanh(g[:, 2 * Hh:3 * Hh])
            o = 1.0 / (1.0 + np.exp(-g[:, 3 * Hh:]))
            c = f * c + i * gg
            h = o * np.tanh(c)
            out[:, t] = h
        return out

    span_hid = np.concatenate(
        [lstm_dir(params['wih_f'], params['whh_f'], params['b_f'], False),
         lstm_dir(params['wih_b'], params['whh_b'], params['b_b'], True)],
        axis=-1)

    attr_hid = np.array(xn)
    lab = np.asarray(span_labels)
    spos = -1                                   # carried across rows, like torch
    for i in range(Bb):
        for j in range(S):
            if lab[i, j] == B_ID:
                spos = j
            elif lab[i, j] == E_ID and spos >= 0:
                attr_hid[i, j] = attr_hid[i, spos:j + 1].mean(axis=0)

    logits_span = span_hid @ np.asarray(params['w_span'], np.float64).T \
        + np.asarray(params['b_span'], np.float64)
    logits_attr = attr_hid @ np.asarray(params['w_attr'], np.float64).T \
        + np.asarray(params['b_attr'], np.float64)
    return logits_span, logits_attr


# ----------------------------------------------------------------------------
if __name__ == "__main__":
    B, S, H = 2, 8, 32          # batch, seq, sequence_encoder.hidden_size
    Hh = H // 2                 # per-direction LSTM hidden

    key = jax.random.PRNGKey(0)
    ks = jax.random.split(key, 12)

    def init(k, shape, scale=0.1):
        return (jax.random.normal(k, shape) * scale).astype(jnp.float32)

    params = {
        # span BiLSTM (nn.LSTM, bidirectional, PyTorch param shapes)
        'wih_f': init(ks[0], (4 * Hh, H)),
        'whh_f': init(ks[1], (4 * Hh, Hh)),
        'b_f':   init(ks[2], (1, 4 * Hh)),     # bias_ih + bias_hh combined
        'wih_b': init(ks[3], (4 * Hh, H)),
        'whh_b': init(ks[4], (4 * Hh, Hh)),
        'b_b':   init(ks[5], (1, 4 * Hh)),
        # mlp_span: Linear(H, len(span2id)), mlp_attr: Linear(H, len(attr2id))
        'w_span': init(ks[6], (NUM_SPAN, H)),
        'b_span': init(ks[7], (1, NUM_SPAN)),
        'w_attr': init(ks[8], (NUM_ATTR, H)),
        'b_attr': init(ks[9], (1, NUM_ATTR)),
    }

    # Encoder hidden states (standing in for sequence_encoder(*args) output)
    seqs_hiddens = jax.random.normal(ks[10], (B, S, H), dtype=jnp.float32)

    # Valid bmoes span labels: B=0, M=1, O=2, E=3, S=4
    span_labels = jnp.array(
        [[0, 1, 3, 2, 4, 2, 0, 3],
         [2, 0, 1, 1, 3, 2, 2, 4]], dtype=jnp.int32)

    prep = prepare_params(params)   # hoisted out of forward (done once)
    logits_span, logits_attr = forward(prep, span_labels, seqs_hiddens)
    jax.block_until_ready((logits_span, logits_attr))

    ref_span, ref_attr = _ref_forward(params, span_labels, seqs_hiddens)
    assert logits_span.shape == (B, S, NUM_SPAN)
    assert logits_attr.shape == (B, S, NUM_ATTR)
    assert np.allclose(np.asarray(logits_span), ref_span, atol=1e-2, rtol=1e-2)
    assert np.allclose(np.asarray(logits_attr), ref_attr, atol=1e-2, rtol=1e-2)

    print("KERNEL_OK")
</pallas_src>

<mosaic_0001>
module attributes {stable_mosaic.version = 11 : i64} {
  func.func @kernel(%arg0: i32, %arg1: memref<8x2x32xf32, #tpu.memory_space<vmem>>, %arg2: memref<32x128xf32, #tpu.memory_space<vmem>>, %arg3: memref<16x64xf32, #tpu.memory_space<vmem>>, %arg4: memref<16x64xf32, #tpu.memory_space<vmem>>, %arg5: memref<1x128xf32, #tpu.memory_space<vmem>>, %arg6: memref<16x128xf32, #tpu.memory_space<vmem>>, %arg7: memref<16x128xf32, #tpu.memory_space<vmem>>, %arg8: memref<1x128xf32, #tpu.memory_space<vmem>>, %arg9: memref<8x2x128xf32, #tpu.memory_space<vmem>>, %arg10: memref<8x2x64xf32, #tpu.memory_space<vmem>>, %arg11: memref<8x2x64xf32, #tpu.memory_space<vmem>>, %arg12: memref<8x2x16xf32, #tpu.memory_space<vmem>>, %arg13: memref<8x2x16xf32, #tpu.memory_space<vmem>>) attributes {dimension_semantics = [#tpu.dimension_semantics<parallel>], iteration_bounds = array<i64: 1>, scalar_prefetch = 0 : i64, scratch_operands = 4 : i64, tpu.core_type = #tpu.core_type<tc>, window_params = [{transform_indices = @transform_0, window_bounds = array<i64: 8, 2, 32>}, {pipeline_mode = #tpu.pipeline_mode<synchronous>, transform_indices = @transform_1, window_bounds = array<i64: 32, 128>}, {pipeline_mode = #tpu.pipeline_mode<synchronous>, transform_indices = @transform_2, window_bounds = array<i64: 16, 64>}, {pipeline_mode = #tpu.pipeline_mode<synchronous>, transform_indices = @transform_3, window_bounds = array<i64: 16, 64>}, {pipeline_mode = #tpu.pipeline_mode<synchronous>, transform_indices = @transform_4, window_bounds = array<i64: 1, 128>}, {pipeline_mode = #tpu.pipeline_mode<synchronous>, transform_indices = @transform_5, window_bounds = array<i64: 16, 128>}, {pipeline_mode = #tpu.pipeline_mode<synchronous>, transform_indices = @transform_6, window_bounds = array<i64: 16, 128>}, {pipeline_mode = #tpu.pipeline_mode<synchronous>, transform_indices = @transform_7, window_bounds = array<i64: 1, 128>}, {transform_indices = @transform_8, window_bounds = array<i64: 8, 2, 128>}]} {
    %c0 = arith.constant 0 : index
    %c0_0 = arith.constant 0 : index
    %c0_1 = arith.constant 0 : index
    %0 = vector.load %arg1[%c0, %c0_0, %c0_1] : memref<8x2x32xf32, #tpu.memory_space<vmem>>, vector<8x2x32xf32>
    %1 = vector.shape_cast %0 : vector<8x2x32xf32> to vector<16x32xf32>
    %c0_2 = arith.constant 0 : index
    %c0_3 = arith.constant 0 : index
    %2 = vector.load %arg2[%c0_2, %c0_3] : memref<32x128xf32, #tpu.memory_space<vmem>>, vector<32x128xf32>
    %cst = arith.constant dense<0.000000e+00> : vector<16x128xf32>
    %3 = tpu.matmul %1, %2, %cst {dimension_numbers = #tpu.dot_dimension_numbers<[1], [0], [0], [1], [0, 0, 1, 1], [], []>} : vector<16x32xf32>, vector<32x128xf32>, vector<16x128xf32> -> vector<16x128xf32>
    %c0_4 = arith.constant 0 : index
    %c0_5 = arith.constant 0 : index
    %4 = vector.load %arg5[%c0_4, %c0_5] : memref<1x128xf32, #tpu.memory_space<vmem>>, vector<1x128xf32>
    %5 = vector.broadcast %4 : vector<1x128xf32> to vector<16x128xf32>
    %6 = arith.addf %3, %5 : vector<16x128xf32>
    %7 = vector.extract_strided_slice %6 {offsets = [0, 0], sizes = [16, 64], strides = [1, 1]} : vector<16x128xf32> to vector<16x64xf32>
    %8 = vector.shape_cast %7 : vector<16x64xf32> to vector<8x2x64xf32>
    %c0_6 = arith.constant 0 : index
    %c0_7 = arith.constant 0 : index
    %c0_8 = arith.constant 0 : index
    %9 = vector.load %arg10[%c0_6, %c0_7, %c0_8] : memref<8x2x64xf32, #tpu.memory_space<vmem>>, vector<8x2x64xf32>
    tpu.vector_store %arg10[%c0_6, %c0_7, %c0_8], %8 {strides = array<i32>} : memref<8x2x64xf32, #tpu.memory_space<vmem>>, vector<8x2x64xf32>,
    %10 = vector.extract_strided_slice %6 {offsets = [0, 64], sizes = [16, 64], strides = [1, 1]} : vector<16x128xf32> to vector<16x64xf32>
    %11 = vector.shape_cast %10 : vector<16x64xf32> to vector<8x2x64xf32>
    %c0_9 = arith.constant 0 : index
    %c0_10 = arith.constant 0 : index
    %c0_11 = arith.constant 0 : index
    %12 = vector.load %arg11[%c0_9, %c0_10, %c0_11] : memref<8x2x64xf32, #tpu.memory_space<vmem>>, vector<8x2x64xf32>
    tpu.vector_store %arg11[%c0_9, %c0_10, %c0_11], %11 {strides = array<i32>} : memref<8x2x64xf32, #tpu.memory_space<vmem>>, vector<8x2x64xf32>,
    %c0_12 = arith.constant 0 : index
    %c0_13 = arith.constant 0 : index
    %13 = vector.load %arg3[%c0_12, %c0_13] : memref<16x64xf32, #tpu.memory_space<vmem>>, vector<16x64xf32>
    %c0_14 = arith.constant 0 : index
    %c0_15 = arith.constant 0 : index
    %14 = vector.load %arg4[%c0_14, %c0_15] : memref<16x64xf32, #tpu.memory_space<vmem>>, vector<16x64xf32>
    %cst_16 = arith.constant 0.000000e+00 : f32
    %15 = vector.broadcast %cst_16 : f32 to vector<2x16xf32>
    %c0_i32 = arith.constant 0 : i32
    %c7_i32 = arith.constant 7 : i32
    %16 = arith.subi %c7_i32, %c0_i32 : i32
    %17 = arith.index_cast %c0_i32 : i32 to index
    %c0_17 = arith.constant 0 : index
    %c0_18 = arith.constant 0 : index
    %18 = vector.load %arg10[%17, %c0_17, %c0_18] : memref<8x2x64xf32, #tpu.memory_space<vmem>>, vector<1x2x64xf32>
    %19 = vector.shape_cast %18 : vector<1x2x64xf32> to vector<2x64xf32>
    %cst_19 = arith.constant dense<0.000000e+00> : vector<2x64xf32>
    %20 = tpu.matmul %15, %13, %cst_19 {dimension_numbers = #tpu.dot_dimension_numbers<[1], [0], [0], [1], [0, 0, 1, 1], [], []>} : vector<2x16xf32>, vector<16x64xf32>, vector<2x64xf32> -> vector<2x64xf32>
    %21 = arith.addf %19, %20 : vector<2x64xf32>
    %22 = arith.index_cast %16 : i32 to index
    %c0_20 = arith.constant 0 : index
    %c0_21 = arith.constant 0 : index
    %23 = vector.load %arg11[%22, %c0_20, %c0_21] : memref<8x2x64xf32, #tpu.memory_space<vmem>>, vector<1x2x64xf32>
    %24 = vector.shape_cast %23 : vector<1x2x64xf32> to vector<2x64xf32>
    %cst_22 = arith.constant dense<0.000000e+00> : vector<2x64xf32>
    %25 = tpu.matmul %15, %14, %cst_22 {dimension_numbers = #tpu.dot_dimension_numbers<[1], [0], [0], [1], [0, 0, 1, 1], [], []>} : vector<2x16xf32>, vector<16x64xf32>, vector<2x64xf32> -> vector<2x64xf32>
    %26 = arith.addf %24, %25 : vector<2x64xf32>
    %27 = vector.extract_strided_slice %21 {offsets = [0, 0], sizes = [2, 16], strides = [1, 1]} : vector<2x64xf32> to vector<2x16xf32>
    %cst_23 = arith.constant 5.000000e-01 : f32
    %28 = vector.broadcast %cst_23 : f32 to vector<2x16xf32>
    %29 = arith.mulf %28, %27 : vector<2x16xf32>
    %30 = math.tanh %29 : vector<2x16xf32>
    %cst_24 = arith.constant 5.000000e-01 : f32
    %31 = vector.broadcast %cst_24 : f32 to vector<2x16xf32>
    %32 = arith.mulf %31, %30 : vector<2x16xf32>
    %cst_25 = arith.constant 5.000000e-01 : f32
    %33 = vector.broadcast %cst_25 : f32 to vector<2x16xf32>
    %34 = arith.addf %32, %33 : vector<2x16xf32>
    %35 = vector.extract_strided_slice %21 {offsets = [0, 16], sizes = [2, 16], strides = [1, 1]} : vector<2x64xf32> to vector<2x16xf32>
    %cst_26 = arith.constant 5.000000e-01 : f32
    %36 = vector.broadcast %cst_26 : f32 to vector<2x16xf32>
    %37 = arith.mulf %36, %35 : vector<2x16xf32>
    %38 = math.tanh %37 : vector<2x16xf32>
    %cst_27 = arith.constant 5.000000e-01 : f32
    %39 = vector.broadcast %cst_27 : f32 to vector<2x16xf32>
    %40 = arith.mulf %39, %38 : vector<2x16xf32>
    %cst_28 = arith.constant 5.000000e-01 : f32
    %41 = vector.broadcast %cst_28 : f32 to vector<2x16xf32>
    %42 = arith.addf %40, %41 : vector<2x16xf32>
    %43 = vector.extract_strided_slice %21 {offsets = [0, 32], sizes = [2, 16], strides = [1, 1]} : vector<2x64xf32> to vector<2x16xf32>
    %44 = math.tanh %43 : vector<2x16xf32>
    %45 = vector.extract_strided_slice %21 {offsets = [0, 48], sizes = [2, 16], strides = [1, 1]} : vector<2x64xf32> to vector<2x16xf32>
    %cst_29 = arith.constant 5.000000e-01 : f32
    %46 = vector.broadcast %cst_29 : f32 to vector<2x16xf32>
    %47 = arith.mulf %46, %45 : vector<2x16xf32>
    %48 = math.tanh %47 : vector<2x16xf32>
    %cst_30 = arith.constant 5.000000e-01 : f32
    %49 = vector.broadcast %cst_30 : f32 to vector<2x16xf32>
    %50 = arith.mulf %49, %48 : vector<2x16xf32>
    %cst_31 = arith.constant 5.000000e-01 : f32
    %51 = vector.broadcast %cst_31 : f32 to vector<2x16xf32>
    %52 = arith.addf %50, %51 : vector<2x16xf32>
    %53 = arith.mulf %42, %15 : vector<2x16xf32>
    %54 = arith.mulf %34, %44 : vector<2x16xf32>
    %55 = arith.addf %53, %54 : vector<2x16xf32>
    %56 = math.tanh %55 : vector<2x16xf32>
    %57 = arith.mulf %52, %56 : vector<2x16xf32>
    %58 = vector.extract_strided_slice %26 {offsets = [0, 0], sizes = [2, 16], strides = [1, 1]} : vector<2x64xf32> to vector<2x16xf32>
    %cst_32 = arith.constant 5.000000e-01 : f32
    %59 = vector.broadcast %cst_32 : f32 to vector<2x16xf32>
    %60 = arith.mulf %59, %58 : vector<2x16xf32>
    %61 = math.tanh %60 : vector<2x16xf32>
    %cst_33 = arith.constant 5.000000e-01 : f32
    %62 = vector.broadcast %cst_33 : f32 to vector<2x16xf32>
    %63 = arith.mulf %62, %61 : vector<2x16xf32>
    %cst_34 = arith.constant 5.000000e-01 : f32
    %64 = vector.broadcast %cst_34 : f32 to vector<2x16xf32>
    %65 = arith.addf %63, %64 : vector<2x16xf32>
    %66 = vector.extract_strided_slice %26 {offsets = [0, 16], sizes = [2, 16], strides = [1, 1]} : vector<2x64xf32> to vector<2x16xf32>
    %cst_35 = arith.constant 5.000000e-01 : f32
    %67 = vector.broadcast %cst_35 : f32 to vector<2x16xf32>
    %68 = arith.mulf %67, %66 : vector<2x16xf32>
    %69 = math.tanh %68 : vector<2x16xf32>
    %cst_36 = arith.constant 5.000000e-01 : f32
    %70 = vector.broadcast %cst_36 : f32 to vector<2x16xf32>
    %71 = arith.mulf %70, %69 : vector<2x16xf32>
    %cst_37 = arith.constant 5.000000e-01 : f32
    %72 = vector.broadcast %cst_37 : f32 to vector<2x16xf32>
    %73 = arith.addf %71, %72 : vector<2x16xf32>
    %74 = vector.extract_strided_slice %26 {offsets = [0, 32], sizes = [2, 16], strides = [1, 1]} : vector<2x64xf32> to vector<2x16xf32>
    %75 = math.tanh %74 : vector<2x16xf32>
    %76 = vector.extract_strided_slice %26 {offsets = [0, 48], sizes = [2, 16], strides = [1, 1]} : vector<2x64xf32> to vector<2x16xf32>
    %cst_38 = arith.constant 5.000000e-01 : f32
    %77 = vector.broadcast %cst_38 : f32 to vector<2x16xf32>
    %78 = arith.mulf %77, %76 : vector<2x16xf32>
    %79 = math.tanh %78 : vector<2x16xf32>
    %cst_39 = arith.constant 5.000000e-01 : f32
    %80 = vector.broadcast %cst_39 : f32 to vector<2x16xf32>
    %81 = arith.mulf %80, %79 : vector<2x16xf32>
    %cst_40 = arith.constant 5.000000e-01 : f32
    %82 = vector.broadcast %cst_40 : f32 to vector<2x16xf32>
    %83 = arith.addf %81, %82 : vector<2x16xf32>
    %84 = arith.mulf %73, %15 : vector<2x16xf32>
    %85 = arith.mulf %65, %75 : vector<2x16xf32>
    %86 = arith.addf %84, %85 : vector<2x16xf32>
    %87 = math.tanh %86 : vector<2x16xf32>
    %88 = arith.mulf %83, %87 : vector<2x16xf32>
    %89 = arith.index_cast %c0_i32 : i32 to index
    %c0_41 = arith.constant 0 : index
    %c0_42 = arith.constant 0 : index
    %90 = vector.load %arg12[%89, %c0_41, %c0_42] : memref<8x2x16xf32, #tpu.memory_space<vmem>>, vector<1x2x16xf32>
    %91 = vector.shape_cast %90 : vector<1x2x16xf32> to vector<2x16xf32>
    %92 = vector.shape_cast %57 : vector<2x16xf32> to vector<1x2x16xf32>
    tpu.vector_store %arg12[%89, %c0_41, %c0_42], %92 {strides = array<i32>} : memref<8x2x16xf32, #tpu.memory_space<vmem>>, vector<1x2x16xf32>,
    %93 = arith.index_cast %16 : i32 to index
    %c0_43 = arith.constant 0 : index
    %c0_44 = arith.constant 0 : index
    %94 = vector.load %arg13[%93, %c0_43, %c0_44] : memref<8x2x16xf32, #tpu.memory_space<vmem>>, vector<1x2x16xf32>
    %95 = vector.shape_cast %94 : vector<1x2x16xf32> to vector<2x16xf32>
    %96 = vector.shape_cast %88 : vector<2x16xf32> to vector<1x2x16xf32>
    tpu.vector_store %arg13[%93, %c0_43, %c0_44], %96 {strides = array<i32>} : memref<8x2x16xf32, #tpu.memory_space<vmem>>, vector<1x2x16xf32>,
    %c1_i32 = arith.constant 1 : i32
    %c7_i32_45 = arith.constant 7 : i32
    %97 = arith.subi %c7_i32_45, %c1_i32 : i32
    %98 = arith.index_cast %c1_i32 : i32 to index
    %c0_46 = arith.constant 0 : index
    %c0_47 = arith.constant 0 : index
    %99 = vector.load %arg10[%98, %c0_46, %c0_47] : memref<8x2x64xf32, #tpu.memory_space<vmem>>, vector<1x2x64xf32>
    %100 = vector.shape_cast %99 : vector<1x2x64xf32> to vector<2x64xf32>
    %cst_48 = arith.constant dense<0.000000e+00> : vector<2x64xf32>
    %101 = tpu.matmul %57, %13, %cst_48 {dimension_numbers = #tpu.dot_dimension_numbers<[1], [0], [0], [1], [0, 0, 1, 1], [], []>} : vector<2x16xf32>, vector<16x64xf32>, vector<2x64xf32> -> vector<2x64xf32>
    %102 = arith.addf %100, %101 : vector<2x64xf32>
    %103 = arith.index_cast %97 : i32 to index
    %c0_49 = arith.constant 0 : index
    %c0_50 = arith.constant 0 : index
    %104 = vector.load %arg11[%103, %c0_49, %c0_50] : memref<8x2x64xf32, #tpu.memory_space<vmem>>, vector<1x2x64xf32>
    %105 = vector.shape_cast %104 : vector<1x2x64xf32> to vector<2x64xf32>
    %cst_51 = arith.constant dense<0.000000e+00> : vector<2x64xf32>
    %106 = tpu.matmul %88, %14, %cst_51 {dimension_numbers = #tpu.dot_dimension_numbers<[1], [0], [0], [1], [0, 0, 1, 1], [], []>} : vector<2x16xf32>, vector<16x64xf32>, vector<2x64xf32> -> vector<2x64xf32>
    %107 = arith.addf %105, %106 : vector<2x64xf32>
    %108 = vector.extract_strided_slice %102 {offsets = [0, 0], sizes = [2, 16], strides = [1, 1]} : vector<2x64xf32> to vector<2x16xf32>
    %cst_52 = arith.constant 5.000000e-01 : f32
    %109 = vector.broadcast %cst_52 : f32 to vector<2x16xf32>
    %110 = arith.mulf %109, %108 : vector<2x16xf32>
    %111 = math.tanh %110 : vector<2x16xf32>
    %cst_53 = arith.constant 5.000000e-01 : f32
    %112 = vector.broadcast %cst_53 : f32 to vector<2x16xf32>
    %113 = arith.mulf %112, %111 : vector<2x16xf32>
    %cst_54 = arith.constant 5.000000e-01 : f32
    %114 = vector.broadcast %cst_54 : f32 to vector<2x16xf32>
    %115 = arith.addf %113, %114 : vector<2x16xf32>
    %116 = vector.extract_strided_slice %102 {offsets = [0, 16], sizes = [2, 16], strides = [1, 1]} : vector<2x64xf32> to vector<2x16xf32>
    %cst_55 = arith.constant 5.000000e-01 : f32
    %117 = vector.broadcast %cst_55 : f32 to vector<2x16xf32>
    %118 = arith.mulf %117, %116 : vector<2x16xf32>
    %119 = math.tanh %118 : vector<2x16xf32>
    %cst_56 = arith.constant 5.000000e-01 : f32
    %120 = vector.broadcast %cst_56 : f32 to vector<2x16xf32>
    %121 = arith.mulf %120, %119 : vector<2x16xf32>
    %cst_57 = arith.constant 5.000000e-01 : f32
    %122 = vector.broadcast %cst_57 : f32 to vector<2x16xf32>
    %123 = arith.addf %121, %122 : vector<2x16xf32>
    %124 = vector.extract_strided_slice %102 {offsets = [0, 32], sizes = [2, 16], strides = [1, 1]} : vector<2x64xf32> to vector<2x16xf32>
    %125 = math.tanh %124 : vector<2x16xf32>
    %126 = vector.extract_strided_slice %102 {offsets = [0, 48], sizes = [2, 16], strides = [1, 1]} : vector<2x64xf32> to vector<2x16xf32>
    %cst_58 = arith.constant 5.000000e-01 : f32
    %127 = vector.broadcast %cst_58 : f32 to vector<2x16xf32>
    %128 = arith.mulf %127, %126 : vector<2x16xf32>
    %129 = math.tanh %128 : vector<2x16xf32>
    %cst_59 = arith.constant 5.000000e-01 : f32
    %130 = vector.broadcast %cst_59 : f32 to vector<2x16xf32>
    %131 = arith.mulf %130, %129 : vector<2x16xf32>
    %cst_60 = arith.constant 5.000000e-01 : f32
    %132 = vector.broadcast %cst_60 : f32 to vector<2x16xf32>
    %133 = arith.addf %131, %132 : vector<2x16xf32>
    %134 = arith.mulf %123, %55 : vector<2x16xf32>
    %135 = arith.mulf %115, %125 : vector<2x16xf32>
    %136 = arith.addf %134, %135 : vector<2x16xf32>
    %137 = math.tanh %136 : vector<2x16xf32>
    %138 = arith.mulf %133, %137 : vector<2x16xf32>
    %139 = vector.extract_strided_slice %107 {offsets = [0, 0], sizes = [2, 16], strides = [1, 1]} : vector<2x64xf32> to vector<2x16xf32>
    %cst_61 = arith.constant 5.000000e-01 : f32
    %140 = vector.broadcast %cst_61 : f32 to vector<2x16xf32>
    %141 = arith.mulf %140, %139 : vector<2x16xf32>
    %142 = math.tanh %141 : vector<2x16xf32>
    %cst_62 = arith.constant 5.000000e-01 : f32
    %143 = vector.broadcast %cst_62 : f32 to vector<2x16xf32>
    %144 = arith.mulf %143, %142 : vector<2x16xf32>
    %cst_63 = arith.constant 5.000000e-01 : f32
    %145 = vector.broadcast %cst_63 : f32 to vector<2x16xf32>
    %146 = arith.addf %144, %145 : vector<2x16xf32>
    %147 = vector.extract_strided_slice %107 {offsets = [0, 16], sizes = [2, 16], strides = [1, 1]} : vector<2x64xf32> to vector<2x16xf32>
    %cst_64 = arith.constant 5.000000e-01 : f32
    %148 = vector.broadcast %cst_64 : f32 to vector<2x16xf32>
    %149 = arith.mulf %148, %147 : vector<2x16xf32>
    %150 = math.tanh %149 : vector<2x16xf32>
    %cst_65 = arith.constant 5.000000e-01 : f32
    %151 = vector.broadcast %cst_65 : f32 to vector<2x16xf32>
    %152 = arith.mulf %151, %150 : vector<2x16xf32>
    %cst_66 = arith.constant 5.000000e-01 : f32
    %153 = vector.broadcast %cst_66 : f32 to vector<2x16xf32>
    %154 = arith.addf %152, %153 : vector<2x16xf32>
    %155 = vector.extract_strided_slice %107 {offsets = [0, 32], sizes = [2, 16], strides = [1, 1]} : vector<2x64xf32> to vector<2x16xf32>
    %156 = math.tanh %155 : vector<2x16xf32>
    %157 = vector.extract_strided_slice %107 {offsets = [0, 48], sizes = [2, 16], strides = [1, 1]} : vector<2x64xf32> to vector<2x16xf32>
    %cst_67 = arith.constant 5.000000e-01 : f32
    %158 = vector.broadcast %cst_67 : f32 to vector<2x16xf32>
    %159 = arith.mulf %158, %157 : vector<2x16xf32>
    %160 = math.tanh %159 : vector<2x16xf32>
    %cst_68 = arith.constant 5.000000e-01 : f32
    %161 = vector.broadcast %cst_68 : f32 to vector<2x16xf32>
    %162 = arith.mulf %161, %160 : vector<2x16xf32>
    %cst_69 = arith.constant 5.000000e-01 : f32
    %163 = vector.broadcast %cst_69 : f32 to vector<2x16xf32>
    %164 = arith.addf %162, %163 : vector<2x16xf32>
    %165 = arith.mulf %154, %86 : vector<2x16xf32>
    %166 = arith.mulf %146, %156 : vector<2x16xf32>
    %167 = arith.addf %165, %166 : vector<2x16xf32>
    %168 = math.tanh %167 : vector<2x16xf32>
    %169 = arith.mulf %164, %168 : vector<2x16xf32>
    %170 = arith.index_cast %c1_i32 : i32 to index
    %c0_70 = arith.constant 0 : index
    %c0_71 = arith.constant 0 : index
    %171 = vector.load %arg12[%170, %c0_70, %c0_71] : memref<8x2x16xf32, #tpu.memory_space<vmem>>, vector<1x2x16xf32>
    %172 = vector.shape_cast %171 : vector<1x2x16xf32> to vector<2x16xf32>
    %173 = vector.shape_cast %138 : vector<2x16xf32> to vector<1x2x16xf32>
    tpu.vector_store %arg12[%170, %c0_70, %c0_71], %173 {strides = array<i32>} : memref<8x2x16xf32, #tpu.memory_space<vmem>>, vector<1x2x16xf32>,
    %174 = arith.index_cast %97 : i32 to index
    %c0_72 = arith.constant 0 : index
    %c0_73 = arith.constant 0 : index
    %175 = vector.load %arg13[%174, %c0_72, %c0_73] : memref<8x2x16xf32, #tpu.memory_space<vmem>>, vector<1x2x16xf32>
    %176 = vector.shape_cast %175 : vector<1x2x16xf32> to vector<2x16xf32>
    %177 = vector.shape_cast %169 : vector<2x16xf32> to vector<1x2x16xf32>
    tpu.vector_store %arg13[%174, %c0_72, %c0_73], %177 {strides = array<i32>} : memref<8x2x16xf32, #tpu.memory_space<vmem>>, vector<1x2x16xf32>,
    %c2_i32 = arith.constant 2 : i32
    %c7_i32_74 = arith.constant 7 : i32
    %178 = arith.subi %c7_i32_74, %c2_i32 : i32
    %179 = arith.index_cast %c2_i32 : i32 to index
    %c0_75 = arith.constant 0 : index
    %c0_76 = arith.constant 0 : index
    %180 = vector.load %arg10[%179, %c0_75, %c0_76] : memref<8x2x64xf32, #tpu.memory_space<vmem>>, vector<1x2x64xf32>
    %181 = vector.shape_cast %180 : vector<1x2x64xf32> to vector<2x64xf32>
    %cst_77 = arith.constant dense<0.000000e+00> : vector<2x64xf32>
    %182 = tpu.matmul %138, %13, %cst_77 {dimension_numbers = #tpu.dot_dimension_numbers<[1], [0], [0], [1], [0, 0, 1, 1], [], []>} : vector<2x16xf32>, vector<16x64xf32>, vector<2x64xf32> -> vector<2x64xf32>
    %183 = arith.addf %181, %182 : vector<2x64xf32>
    %184 = arith.index_cast %178 : i32 to index
    %c0_78 = arith.constant 0 : index
    %c0_79 = arith.constant 0 : index
    %185 = vector.load %arg11[%184, %c0_78, %c0_79] : memref<8x2x64xf32, #tpu.memory_space<vmem>>, vector<1x2x64xf32>
    %186 = vector.shape_cast %185 : vector<1x2x64xf32> to vector<2x64xf32>
    %cst_80 = arith.constant dense<0.000000e+00> : vector<2x64xf32>
    %187 = tpu.matmul %169, %14, %cst_80 {dimension_numbers = #tpu.dot_dimension_numbers<[1], [0], [0], [1], [0, 0, 1, 1], [], []>} : vector<2x16xf32>, vector<16x64xf32>, vector<2x64xf32> -> vector<2x64xf32>
    %188 = arith.addf %186, %187 : vector<2x64xf32>
    %189 = vector.extract_strided_slice %183 {offsets = [0, 0], sizes = [2, 16], strides = [1, 1]} : vector<2x64xf32> to vector<2x16xf32>
    %cst_81 = arith.constant 5.000000e-01 : f32
    %190 = vector.broadcast %cst_81 : f32 to vector<2x16xf32>
    %191 = arith.mulf %190, %189 : vector<2x16xf32>
    %192 = math.tanh %191 : vector<2x16xf32>
    %cst_82 = arith.constant 5.000000e-01 : f32
    %193 = vector.broadcast %cst_82 : f32 to vector<2x16xf32>
    %194 = arith.mulf %193, %192 : vector<2x16xf32>
    %cst_83 = arith.constant 5.000000e-01 : f32
    %195 = vector.broadcast %cst_83 : f32 to vector<2x16xf32>
    %196 = arith.addf %194, %195 : vector<2x16xf32>
    %197 = vector.extract_strided_slice %183 {offsets = [0, 16], sizes = [2, 16], strides = [1, 1]} : vector<2x64xf32> to vector<2x16xf32>
    %cst_84 = arith.constant 5.000000e-01 : f32
    %198 = vector.broadcast %cst_84 : f32 to vector<2x16xf32>
    %199 = arith.mulf %198, %197 : vector<2x16xf32>
    %200 = math.tanh %199 : vector<2x16xf32>
    %cst_85 = arith.constant 5.000000e-01 : f32
    %201 = vector.broadcast %cst_85 : f32 to vector<2x16xf32>
    %202 = arith.mulf %201, %200 : vector<2x16xf32>
    %cst_86 = arith.constant 5.000000e-01 : f32
    %203 = vector.broadcast %cst_86 : f32 to vector<2x16xf32>
    %204 = arith.addf %202, %203 : vector<2x16xf32>
    %205 = vector.extract_strided_slice %183 {offsets = [0, 32], sizes = [2, 16], strides = [1, 1]} : vector<2x64xf32> to vector<2x16xf32>
    %206 = math.tanh %205 : vector<2x16xf32>
    %207 = vector.extract_strided_slice %183 {offsets = [0, 48], sizes = [2, 16], strides = [1, 1]} : vector<2x64xf32> to vector<2x16xf32>
    %cst_87 = arith.constant 5.000000e-01 : f32
    %208 = vector.broadcast %cst_87 : f32 to vector<2x16xf32>
    %209 = arith.mulf %208, %207 : vector<2x16xf32>
    %210 = math.tanh %209 : vector<2x16xf32>
    %cst_88 = arith.constant 5.000000e-01 : f32
    %211 = vector.broadcast %cst_88 : f32 to vector<2x16xf32>
    %212 = arith.mulf %211, %210 : vector<2x16xf32>
    %cst_89 = arith.constant 5.000000e-01 : f32
    %213 = vector.broadcast %cst_89 : f32 to vector<2x16xf32>
    %214 = arith.addf %212, %213 : vector<2x16xf32>
    %215 = arith.mulf %204, %136 : vector<2x16xf32>
    %216 = arith.mulf %196, %206 : vector<2x16xf32>
    %217 = arith.addf %215, %216 : vector<2x16xf32>
    %218 = math.tanh %217 : vector<2x16xf32>
    %219 = arith.mulf %214, %218 : vector<2x16xf32>
    %220 = vector.extract_strided_slice %188 {offsets = [0, 0], sizes = [2, 16], strides = [1, 1]} : vector<2x64xf32> to vector<2x16xf32>
    %cst_90 = arith.constant 5.000000e-01 : f32
    %221 = vector.broadcast %cst_90 : f32 to vector<2x16xf32>
    %222 = arith.mulf %221, %220 : vector<2x16xf32>
    %223 = math.tanh %222 : vector<2x16xf32>
    %cst_91 = arith.constant 5.000000e-01 : f32
    %224 = vector.broadcast %cst_91 : f32 to vector<2x16xf32>
    %225 = arith.mulf %224, %223 : vector<2x16xf32>
    %cst_92 = arith.constant 5.000000e-01 : f32
    %226 = vector.broadcast %cst_92 : f32 to vector<2x16xf32>
    %227 = arith.addf %225, %226 : vector<2x16xf32>
    %228 = vector.extract_strided_slice %188 {offsets = [0, 16], sizes = [2, 16], strides = [1, 1]} : vector<2x64xf32> to vector<2x16xf32>
    %cst_93 = arith.constant 5.000000e-01 : f32
    %229 = vector.broadcast %cst_93 : f32 to vector<2x16xf32>
    %230 = arith.mulf %229, %228 : vector<2x16xf32>
    %231 = math.tanh %230 : vector<2x16xf32>
    %cst_94 = arith.constant 5.000000e-01 : f32
    %232 = vector.broadcast %cst_94 : f32 to vector<2x16xf32>
    %233 = arith.mulf %232, %231 : vector<2x16xf32>
    %cst_95 = arith.constant 5.000000e-01 : f32
    %234 = vector.broadcast %cst_95 : f32 to vector<2x16xf32>
    %235 = arith.addf %233, %234 : vector<2x16xf32>
    %236 = vector.extract_strided_slice %188 {offsets = [0, 32], sizes = [2, 16], strides = [1, 1]} : vector<2x64xf32> to vector<2x16xf32>
    %237 = math.tanh %236 : vector<2x16xf32>
    %238 = vector.extract_strided_slice %188 {offsets = [0, 48], sizes = [2, 16], strides = [1, 1]} : vector<2x64xf32> to vector<2x16xf32>
    %cst_96 = arith.constant 5.000000e-01 : f32
    %239 = vector.broadcast %cst_96 : f32 to vector<2x16xf32>
    %240 = arith.mulf %239, %238 : vector<2x16xf32>
    %241 = math.tanh %240 : vector<2x16xf32>
    %cst_97 = arith.constant 5.000000e-01 : f32
    %242 = vector.broadcast %cst_97 : f32 to vector<2x16xf32>
    %243 = arith.mulf %242, %241 : vector<2x16xf32>
    %cst_98 = arith.constant 5.000000e-01 : f32
    %244 = vector.broadcast %cst_98 : f32 to vector<2x16xf32>
    %245 = arith.addf %243, %244 : vector<2x16xf32>
    %246 = arith.mulf %235, %167 : vector<2x16xf32>
    %247 = arith.mulf %227, %237 : vector<2x16xf32>
    %248 = arith.addf %246, %247 : vector<2x16xf32>
    %249 = math.tanh %248 : vector<2x16xf32>
    %250 = arith.mulf %245, %249 : vector<2x16xf32>
    %251 = arith.index_cast %c2_i32 : i32 to index
    %c0_99 = arith.constant 0 : index
    %c0_100 = arith.constant 0 : index
    %252 = vector.load %arg12[%251, %c0_99, %c0_100] : memref<8x2x16xf32, #tpu.memory_space<vmem>>, vector<1x2x16xf32>
    %253 = vector.shape_cast %252 : vector<1x2x16xf32> to vector<2x16xf32>
    %254 = vector.shape_cast %219 : vector<2x16xf32> to vector<1x2x16xf32>
    tpu.vector_store %arg12[%251, %c0_99, %c0_100], %254 {strides = array<i32>} : memref<8x2x16xf32, #tpu.memory_space<vmem>>, vector<1x2x16xf32>,
    %255 = arith.index_cast %178 : i32 to index
    %c0_101 = arith.constant 0 : index
    %c0_102 = arith.constant 0 : index
    %256 = vector.load %arg13[%255, %c0_101, %c0_102] : memref<8x2x16xf32, #tpu.memory_space<vmem>>, vector<1x2x16xf32>
    %257 = vector.shape_cast %256 : vector<1x2x16xf32> to vector<2x16xf32>
    %258 = vector.shape_cast %250 : vector<2x16xf32> to vector<1x2x16xf32>
    tpu.vector_store %arg13[%255, %c0_101, %c0_102], %258 {strides = array<i32>} : memref<8x2x16xf32, #tpu.memory_space<vmem>>, vector<1x2x16xf32>,
    %c3_i32 = arith.constant 3 : i32
    %c7_i32_103 = arith.constant 7 : i32
    %259 = arith.subi %c7_i32_103, %c3_i32 : i32
    %260 = arith.index_cast %c3_i32 : i32 to index
    %c0_104 = arith.constant 0 : index
    %c0_105 = arith.constant 0 : index
    %261 = vector.load %arg10[%260, %c0_104, %c0_105] : memref<8x2x64xf32, #tpu.memory_space<vmem>>, vector<1x2x64xf32>
    %262 = vector.shape_cast %261 : vector<1x2x64xf32> to vector<2x64xf32>
    %cst_106 = arith.constant dense<0.000000e+00> : vector<2x64xf32>
    %263 = tpu.matmul %219, %13, %cst_106 {dimension_numbers = #tpu.dot_dimension_numbers<[1], [0], [0], [1], [0, 0, 1, 1], [], []>} : vector<2x16xf32>, vector<16x64xf32>, vector<2x64xf32> -> vector<2x64xf32>
    %264 = arith.addf %262, %263 : vector<2x64xf32>
    %265 = arith.index_cast %259 : i32 to index
    %c0_107 = arith.constant 0 : index
    %c0_108 = arith.constant 0 : index
    %266 = vector.load %arg11[%265, %c0_107, %c0_108] : memref<8x2x64xf32, #tpu.memory_space<vmem>>, vector<1x2x64xf32>
    %267 = vector.shape_cast %266 : vector<1x2x64xf32> to vector<2x64xf32>
    %cst_109 = arith.constant dense<0.000000e+00> : vector<2x64xf32>
    %268 = tpu.matmul %250, %14, %cst_109 {dimension_numbers = #tpu.dot_dimension_numbers<[1], [0], [0], [1], [0, 0, 1, 1], [], []>} : vector<2x16xf32>, vector<16x64xf32>, vector<2x64xf32> -> vector<2x64xf32>
    %269 = arith.addf %267, %268 : vector<2x64xf32>
    %270 = vector.extract_strided_slice %264 {offsets = [0, 0], sizes = [2, 16], strides = [1, 1]} : vector<2x64xf32> to vector<2x16xf32>
    %cst_110 = arith.constant 5.000000e-01 : f32
    %271 = vector.broadcast %cst_110 : f32 to vector<2x16xf32>
    %272 = arith.mulf %271, %270 : vector<2x16xf32>
    %273 = math.tanh %272 : vector<2x16xf32>
    %cst_111 = arith.constant 5.000000e-01 : f32
    %274 = vector.broadcast %cst_111 : f32 to vector<2x16xf32>
    %275 = arith.mulf %274, %273 : vector<2x16xf32>
    %cst_112 = arith.constant 5.000000e-01 : f32
    %276 = vector.broadcast %cst_112 : f32 to vector<2x16xf32>
    %277 = arith.addf %275, %276 : vector<2x16xf32>
    %278 = vector.extract_strided_slice %264 {offsets = [0, 16], sizes = [2, 16], strides = [1, 1]} : vector<2x64xf32> to vector<2x16xf32>
    %cst_113 = arith.constant 5.000000e-01 : f32
    %279 = vector.broadcast %cst_113 : f32 to vector<2x16xf32>
    %280 = arith.mulf %279, %278 : vector<2x16xf32>
    %281 = math.tanh %280 : vector<2x16xf32>
    %cst_114 = arith.constant 5.000000e-01 : f32
    %282 = vector.broadcast %cst_114 : f32 to vector<2x16xf32>
    %283 = arith.mulf %282, %281 : vector<2x16xf32>
    %cst_115 = arith.constant 5.000000e-01 : f32
    %284 = vector.broadcast %cst_115 : f32 to vector<2x16xf32>
    %285 = arith.addf %283, %284 : vector<2x16xf32>
    %286 = vector.extract_strided_slice %264 {offsets = [0, 32], sizes = [2, 16], strides = [1, 1]} : vector<2x64xf32> to vector<2x16xf32>
    %287 = math.tanh %286 : vector<2x16xf32>
    %288 = vector.extract_strided_slice %264 {offsets = [0, 48], sizes = [2, 16], strides = [1, 1]} : vector<2x64xf32> to vector<2x16xf32>
    %cst_116 = arith.constant 5.000000e-01 : f32
    %289 = vector.broadcast %cst_116 : f32 to vector<2x16xf32>
    %290 = arith.mulf %289, %288 : vector<2x16xf32>
    %291 = math.tanh %290 : vector<2x16xf32>
    %cst_117 = arith.constant 5.000000e-01 : f32
    %292 = vector.broadcast %cst_117 : f32 to vector<2x16xf32>
    %293 = arith.mulf %292, %291 : vector<2x16xf32>
    %cst_118 = arith.constant 5.000000e-01 : f32
    %294 = vector.broadcast %cst_118 : f32 to vector<2x16xf32>
    %295 = arith.addf %293, %294 : vector<2x16xf32>
    %296 = arith.mulf %285, %217 : vector<2x16xf32>
    %297 = arith.mulf %277, %287 : vector<2x16xf32>
    %298 = arith.addf %296, %297 : vector<2x16xf32>
    %299 = math.tanh %298 : vector<2x16xf32>
    %300 = arith.mulf %295, %299 : vector<2x16xf32>
    %301 = vector.extract_strided_slice %269 {offsets = [0, 0], sizes = [2, 16], strides = [1, 1]} : vector<2x64xf32> to vector<2x16xf32>
    %cst_119 = arith.constant 5.000000e-01 : f32
    %302 = vector.broadcast %cst_119 : f32 to vector<2x16xf32>
    %303 = arith.mulf %302, %301 : vector<2x16xf32>
    %304 = math.tanh %303 : vector<2x16xf32>
    %cst_120 = arith.constant 5.000000e-01 : f32
    %305 = vector.broadcast %cst_120 : f32 to vector<2x16xf32>
    %306 = arith.mulf %305, %304 : vector<2x16xf32>
    %cst_121 = arith.constant 5.000000e-01 : f32
    %307 = vector.broadcast %cst_121 : f32 to vector<2x16xf32>
    %308 = arith.addf %306, %307 : vector<2x16xf32>
    %309 = vector.extract_strided_slice %269 {offsets = [0, 16], sizes = [2, 16], strides = [1, 1]} : vector<2x64xf32> to vector<2x16xf32>
    %cst_122 = arith.constant 5.000000e-01 : f32
    %310 = vector.broadcast %cst_122 : f32 to vector<2x16xf32>
    %311 = arith.mulf %310, %309 : vector<2x16xf32>
    %312 = math.tanh %311 : vector<2x16xf32>
    %cst_123 = arith.constant 5.000000e-01 : f32
    %313 = vector.broadcast %cst_123 : f32 to vector<2x16xf32>
    %314 = arith.mulf %313, %312 : vector<2x16xf32>
    %cst_124 = arith.constant 5.000000e-01 : f32
    %315 = vector.broadcast %cst_124 : f32 to vector<2x16xf32>
    %316 = arith.addf %314, %315 : vector<2x16xf32>
    %317 = vector.extract_strided_slice %269 {offsets = [0, 32], sizes = [2, 16], strides = [1, 1]} : vector<2x64xf32> to vector<2x16xf32>
    %318 = math.tanh %317 : vector<2x16xf32>
    %319 = vector.extract_strided_slice %269 {offsets = [0, 48], sizes = [2, 16], strides = [1, 1]} : vector<2x64xf32> to vector<2x16xf32>
    %cst_125 = arith.constant 5.000000e-01 : f32
    %320 = vector.broadcast %cst_125 : f32 to vector<2x16xf32>
    %321 = arith.mulf %320, %319 : vector<2x16xf32>
    %322 = math.tanh %321 : vector<2x16xf32>
    %cst_126 = arith.constant 5.000000e-01 : f32
    %323 = vector.broadcast %cst_126 : f32 to vector<2x16xf32>
    %324 = arith.mulf %323, %322 : vector<2x16xf32>
    %cst_127 = arith.constant 5.000000e-01 : f32
    %325 = vector.broadcast %cst_127 : f32 to vector<2x16xf32>
    %326 = arith.addf %324, %325 : vector<2x16xf32>
    %327 = arith.mulf %316, %248 : vector<2x16xf32>
    %328 = arith.mulf %308, %318 : vector<2x16xf32>
    %329 = arith.addf %327, %328 : vector<2x16xf32>
    %330 = math.tanh %329 : vector<2x16xf32>
    %331 = arith.mulf %326, %330 : vector<2x16xf32>
    %332 = arith.index_cast %c3_i32 : i32 to index
    %c0_128 = arith.constant 0 : index
    %c0_129 = arith.constant 0 : index
    %333 = vector.load %arg12[%332, %c0_128, %c0_129] : memref<8x2x16xf32, #tpu.memory_space<vmem>>, vector<1x2x16xf32>
    %334 = vector.shape_cast %333 : vector<1x2x16xf32> to vector<2x16xf32>
    %335 = vector.shape_cast %300 : vector<2x16xf32> to vector<1x2x16xf32>
    tpu.vector_store %arg12[%332, %c0_128, %c0_129], %335 {strides = array<i32>} : memref<8x2x16xf32, #tpu.memory_space<vmem>>, vector<1x2x16xf32>,
    %336 = arith.index_cast %259 : i32 to index
    %c0_130 = arith.constant 0 : index
    %c0_131 = arith.constant 0 : index
    %337 = vector.load %arg13[%336, %c0_130, %c0_131] : memref<8x2x16xf32, #tpu.memory_space<vmem>>, vector<1x2x16xf32>
    %338 = vector.shape_cast %337 : vector<1x2x16xf32> to vector<2x16xf32>
    %339 = vector.shape_cast %331 : vector<2x16xf32> to vector<1x2x16xf32>
    tpu.vector_store %arg13[%336, %c0_130, %c0_131], %339 {strides = array<i32>} : memref<8x2x16xf32, #tpu.memory_space<vmem>>, vector<1x2x16xf32>,
    %c4_i32 = arith.constant 4 : i32
    %c7_i32_132 = arith.constant 7 : i32
    %340 = arith.subi %c7_i32_132, %c4_i32 : i32
    %341 = arith.index_cast %c4_i32 : i32 to index
    %c0_133 = arith.constant 0 : index
    %c0_134 = arith.constant 0 : index
    %342 = vector.load %arg10[%341, %c0_133, %c0_134] : memref<8x2x64xf32, #tpu.memory_space<vmem>>, vector<1x2x64xf32>
    %343 = vector.shape_cast %342 : vector<1x2x64xf32> to vector<2x64xf32>
    %cst_135 = arith.constant dense<0.000000e+00> : vector<2x64xf32>
    %344 = tpu.matmul %300, %13, %cst_135 {dimension_numbers = #tpu.dot_dimension_numbers<[1], [0], [0], [1], [0, 0, 1, 1], [], []>} : vector<2x16xf32>, vector<16x64xf32>, vector<2x64xf32> -> vector<2x64xf32>
    %345 = arith.addf %343, %344 : vector<2x64xf32>
    %346 = arith.index_cast %340 : i32 to index
    %c0_136 = arith.constant 0 : index
    %c0_137 = arith.constant 0 : index
    %347 = vector.load %arg11[%346, %c0_136, %c0_137] : memref<8x2x64xf32, #tpu.memory_space<vmem>>, vector<1x2x64xf32>
    %348 = vector.shape_cast %347 : vector<1x2x64xf32> to vector<2x64xf32>
    %cst_138 = arith.constant dense<0.000000e+00> : vector<2x64xf32>
    %349 = tpu.matmul %331, %14, %cst_138 {dimension_numbers = #tpu.dot_dimension_numbers<[1], [0], [0], [1], [0, 0, 1, 1], [], []>} : vector<2x16xf32>, vector<16x64xf32>, vector<2x64xf32> -> vector<2x64xf32>
    %350 = arith.addf %348, %349 : vector<2x64xf32>
    %351 = vector.extract_strided_slice %345 {offsets = [0, 0], sizes = [2, 16], strides = [1, 1]} : vector<2x64xf32> to vector<2x16xf32>
    %cst_139 = arith.constant 5.000000e-01 : f32
    %352 = vector.broadcast %cst_139 : f32 to vector<2x16xf32>
    %353 = arith.mulf %352, %351 : vector<2x16xf32>
    %354 = math.tanh %353 : vector<2x16xf32>
    %cst_140 = arith.constant 5.000000e-01 : f32
    %355 = vector.broadcast %cst_140 : f32 to vector<2x16xf32>
    %356 = arith.mulf %355, %354 : vector<2x16xf32>
    %cst_141 = arith.constant 5.000000e-01 : f32
    %357 = vector.broadcast %cst_141 : f32 to vector<2x16xf32>
    %358 = arith.addf %356, %357 : vector<2x16xf32>
    %359 = vector.extract_strided_slice %345 {offsets = [0, 16], sizes = [2, 16], strides = [1, 1]} : vector<2x64xf32> to vector<2x16xf32>
    %cst_142 = arith.constant 5.000000e-01 : f32
    %360 = vector.broadcast %cst_142 : f32 to vector<2x16xf32>
    %361 = arith.mulf %360, %359 : vector<2x16xf32>
    %362 = math.tanh %361 : vector<2x16xf32>
    %cst_143 = arith.constant 5.000000e-01 : f32
    %363 = vector.broadcast %cst_143 : f32 to vector<2x16xf32>
    %364 = arith.mulf %363, %362 : vector<2x16xf32>
    %cst_144 = arith.constant 5.000000e-01 : f32
    %365 = vector.broadcast %cst_144 : f32 to vector<2x16xf32>
    %366 = arith.addf %364, %365 : vector<2x16xf32>
    %367 = vector.extract_strided_slice %345 {offsets = [0, 32], sizes = [2, 16], strides = [1, 1]} : vector<2x64xf32> to vector<2x16xf32>
    %368 = math.tanh %367 : vector<2x16xf32>
    %369 = vector.extract_strided_slice %345 {offsets = [0, 48], sizes = [2, 16], strides = [1, 1]} : vector<2x64xf32> to vector<2x16xf32>
    %cst_145 = arith.constant 5.000000e-01 : f32
    %370 = vector.broadcast %cst_145 : f32 to vector<2x16xf32>
    %371 = arith.mulf %370, %369 : vector<2x16xf32>
    %372 = math.tanh %371 : vector<2x16xf32>
    %cst_146 = arith.constant 5.000000e-01 : f32
    %373 = vector.broadcast %cst_146 : f32 to vector<2x16xf32>
    %374 = arith.mulf %373, %372 : vector<2x16xf32>
    %cst_147 = arith.constant 5.000000e-01 : f32
    %375 = vector.broadcast %cst_147 : f32 to vector<2x16xf32>
    %376 = arith.addf %374, %375 : vector<2x16xf32>
    %377 = arith.mulf %366, %298 : vector<2x16xf32>
    %378 = arith.mulf %358, %368 : vector<2x16xf32>
    %379 = arith.addf %377, %378 : vector<2x16xf32>
    %380 = math.tanh %379 : vector<2x16xf32>
    %381 = arith.mulf %376, %380 : vector<2x16xf32>
    %382 = vector.extract_strided_slice %350 {offsets = [0, 0], sizes = [2, 16], strides = [1, 1]} : vector<2x64xf32> to vector<2x16xf32>
    %cst_148 = arith.constant 5.000000e-01 : f32
    %383 = vector.broadcast %cst_148 : f32 to vector<2x16xf32>
    %384 = arith.mulf %383, %382 : vector<2x16xf32>
    %385 = math.tanh %384 : vector<2x16xf32>
    %cst_149 = arith.constant 5.000000e-01 : f32
    %386 = vector.broadcast %cst_149 : f32 to vector<2x16xf32>
    %387 = arith.mulf %386, %385 : vector<2x16xf32>
    %cst_150 = arith.constant 5.000000e-01 : f32
    %388 = vector.broadcast %cst_150 : f32 to vector<2x16xf32>
    %389 = arith.addf %387, %388 : vector<2x16xf32>
    %390 = vector.extract_strided_slice %350 {offsets = [0, 16], sizes = [2, 16], strides = [1, 1]} : vector<2x64xf32> to vector<2x16xf32>
    %cst_151 = arith.constant 5.000000e-01 : f32
    %391 = vector.broadcast %cst_151 : f32 to vector<2x16xf32>
    %392 = arith.mulf %391, %390 : vector<2x16xf32>
    %393 = math.tanh %392 : vector<2x16xf32>
    %cst_152 = arith.constant 5.000000e-01 : f32
    %394 = vector.broadcast %cst_152 : f32 to vector<2x16xf32>
    %395 = arith.mulf %394, %393 : vector<2x16xf32>
    %cst_153 = arith.constant 5.000000e-01 : f32
    %396 = vector.broadcast %cst_153 : f32 to vector<2x16xf32>
    %397 = arith.addf %395, %396 : vector<2x16xf32>
    %398 = vector.extract_strided_slice %350 {offsets = [0, 32], sizes = [2, 16], strides = [1, 1]} : vector<2x64xf32> to vector<2x16xf32>
    %399 = math.tanh %398 : vector<2x16xf32>
    %400 = vector.extract_strided_slice %350 {offsets = [0, 48], sizes = [2, 16], strides = [1, 1]} : vector<2x64xf32> to vector<2x16xf32>
    %cst_154 = arith.constant 5.000000e-01 : f32
    %401 = vector.broadcast %cst_154 : f32 to vector<2x16xf32>
    %402 = arith.mulf %401, %400 : vector<2x16xf32>
    %403 = math.tanh %402 : vector<2x16xf32>
    %cst_155 = arith.constant 5.000000e-01 : f32
    %404 = vector.broadcast %cst_155 : f32 to vector<2x16xf32>
    %405 = arith.mulf %404, %403 : vector<2x16xf32>
    %cst_156 = arith.constant 5.000000e-01 : f32
    %406 = vector.broadcast %cst_156 : f32 to vector<2x16xf32>
    %407 = arith.addf %405, %406 : vector<2x16xf32>
    %408 = arith.mulf %397, %329 : vector<2x16xf32>
    %409 = arith.mulf %389, %399 : vector<2x16xf32>
    %410 = arith.addf %408, %409 : vector<2x16xf32>
    %411 = math.tanh %410 : vector<2x16xf32>
    %412 = arith.mulf %407, %411 : vector<2x16xf32>
    %413 = arith.index_cast %c4_i32 : i32 to index
    %c0_157 = arith.constant 0 : index
    %c0_158 = arith.constant 0 : index
    %414 = vector.load %arg12[%413, %c0_157, %c0_158] : memref<8x2x16xf32, #tpu.memory_space<vmem>>, vector<1x2x16xf32>
    %415 = vector.shape_cast %414 : vector<1x2x16xf32> to vector<2x16xf32>
    %416 = vector.shape_cast %381 : vector<2x16xf32> to vector<1x2x16xf32>
    tpu.vector_store %arg12[%413, %c0_157, %c0_158], %416 {strides = array<i32>} : memref<8x2x16xf32, #tpu.memory_space<vmem>>, vector<1x2x16xf32>,
    %417 = arith.index_cast %340 : i32 to index
    %c0_159 = arith.constant 0 : index
    %c0_160 = arith.constant 0 : index
    %418 = vector.load %arg13[%417, %c0_159, %c0_160] : memref<8x2x16xf32, #tpu.memory_space<vmem>>, vector<1x2x16xf32>
    %419 = vector.shape_cast %418 : vector<1x2x16xf32> to vector<2x16xf32>
    %420 = vector.shape_cast %412 : vector<2x16xf32> to vector<1x2x16xf32>
    tpu.vector_store %arg13[%417, %c0_159, %c0_160], %420 {strides = array<i32>} : memref<8x2x16xf32, #tpu.memory_space<vmem>>, vector<1x2x16xf32>,
    %c5_i32 = arith.constant 5 : i32
    %c7_i32_161 = arith.constant 7 : i32
    %421 = arith.subi %c7_i32_161, %c5_i32 : i32
    %422 = arith.index_cast %c5_i32 : i32 to index
    %c0_162 = arith.constant 0 : index
    %c0_163 = arith.constant 0 : index
    %423 = vector.load %arg10[%422, %c0_162, %c0_163] : memref<8x2x64xf32, #tpu.memory_space<vmem>>, vector<1x2x64xf32>
    %424 = vector.shape_cast %423 : vector<1x2x64xf32> to vector<2x64xf32>
    %cst_164 = arith.constant dense<0.000000e+00> : vector<2x64xf32>
    %425 = tpu.matmul %381, %13, %cst_164 {dimension_numbers = #tpu.dot_dimension_numbers<[1], [0], [0], [1], [0, 0, 1, 1], [], []>} : vector<2x16xf32>, vector<16x64xf32>, vector<2x64xf32> -> vector<2x64xf32>
    %426 = arith.addf %424, %425 : vector<2x64xf32>
    %427 = arith.index_cast %421 : i32 to index
    %c0_165 = arith.constant 0 : index
    %c0_166 = arith.constant 0 : index
    %428 = vector.load %arg11[%427, %c0_165, %c0_166] : memref<8x2x64xf32, #tpu.memory_space<vmem>>, vector<1x2x64xf32>
    %429 = vector.shape_cast %428 : vector<1x2x64xf32> to vector<2x64xf32>
    %cst_167 = arith.constant dense<0.000000e+00> : vector<2x64xf32>
    %430 = tpu.matmul %412, %14, %cst_167 {dimension_numbers = #tpu.dot_dimension_numbers<[1], [0], [0], [1], [0, 0, 1, 1], [], []>} : vector<2x16xf32>, vector<16x64xf32>, vector<2x64xf32> -> vector<2x64xf32>
    %431 = arith.addf %429, %430 : vector<2x64xf32>
    %432 = vector.extract_strided_slice %426 {offsets = [0, 0], sizes = [2, 16], strides = [1, 1]} : vector<2x64xf32> to vector<2x16xf32>
    %cst_168 = arith.constant 5.000000e-01 : f32
    %433 = vector.broadcast %cst_168 : f32 to vector<2x16xf32>
    %434 = arith.mulf %433, %432 : vector<2x16xf32>
    %435 = math.tanh %434 : vector<2x16xf32>
    %cst_169 = arith.constant 5.000000e-01 : f32
    %436 = vector.broadcast %cst_169 : f32 to vector<2x16xf32>
    %437 = arith.mulf %436, %435 : vector<2x16xf32>
    %cst_170 = arith.constant 5.000000e-01 : f32
    %438 = vector.broadcast %cst_170 : f32 to vector<2x16xf32>
    %439 = arith.addf %437, %438 : vector<2x16xf32>
    %440 = vector.extract_strided_slice %426 {offsets = [0, 16], sizes = [2, 16], strides = [1, 1]} : vector<2x64xf32> to vector<2x16xf32>
    %cst_171 = arith.constant 5.000000e-01 : f32
    %441 = vector.broadcast %cst_171 : f32 to vector<2x16xf32>
    %442 = arith.mulf %441, %440 : vector<2x16xf32>
    %443 = math.tanh %442 : vector<2x16xf32>
    %cst_172 = arith.constant 5.000000e-01 : f32
    %444 = vector.broadcast %cst_172 : f32 to vector<2x16xf32>
    %445 = arith.mulf %444, %443 : vector<2x16xf32>
    %cst_173 = arith.constant 5.000000e-01 : f32
    %446 = vector.broadcast %cst_173 : f32 to vector<2x16xf32>
    %447 = arith.addf %445, %446 : vector<2x16xf32>
    %448 = vector.extract_strided_slice %426 {offsets = [0, 32], sizes = [2, 16], strides = [1, 1]} : vector<2x64xf32> to vector<2x16xf32>
    %449 = math.tanh %448 : vector<2x16xf32>
    %450 = vector.extract_strided_slice %426 {offsets = [0, 48], sizes = [2, 16], strides = [1, 1]} : vector<2x64xf32> to vector<2x16xf32>
    %cst_174 = arith.constant 5.000000e-01 : f32
    %451 = vector.broadcast %cst_174 : f32 to vector<2x16xf32>
    %452 = arith.mulf %451, %450 : vector<2x16xf32>
    %453 = math.tanh %452 : vector<2x16xf32>
    %cst_175 = arith.constant 5.000000e-01 : f32
    %454 = vector.broadcast %cst_175 : f32 to vector<2x16xf32>
    %455 = arith.mulf %454, %453 : vector<2x16xf32>
    %cst_176 = arith.constant 5.000000e-01 : f32
    %456 = vector.broadcast %cst_176 : f32 to vector<2x16xf32>
    %457 = arith.addf %455, %456 : vector<2x16xf32>
    %458 = arith.mulf %447, %379 : vector<2x16xf32>
    %459 = arith.mulf %439, %449 : vector<2x16xf32>
    %460 = arith.addf %458, %459 : vector<2x16xf32>
    %461 = math.tanh %460 : vector<2x16xf32>
    %462 = arith.mulf %457, %461 : vector<2x16xf32>
    %463 = vector.extract_strided_slice %431 {offsets = [0, 0], sizes = [2, 16], strides = [1, 1]} : vector<2x64xf32> to vector<2x16xf32>
    %cst_177 = arith.constant 5.000000e-01 : f32
    %464 = vector.broadcast %cst_177 : f32 to vector<2x16xf32>
    %465 = arith.mulf %464, %463 : vector<2x16xf32>
    %466 = math.tanh %465 : vector<2x16xf32>
    %cst_178 = arith.constant 5.000000e-01 : f32
    %467 = vector.broadcast %cst_178 : f32 to vector<2x16xf32>
    %468 = arith.mulf %467, %466 : vector<2x16xf32>
    %cst_179 = arith.constant 5.000000e-01 : f32
    %469 = vector.broadcast %cst_179 : f32 to vector<2x16xf32>
    %470 = arith.addf %468, %469 : vector<2x16xf32>
    %471 = vector.extract_strided_slice %431 {offsets = [0, 16], sizes = [2, 16], strides = [1, 1]} : vector<2x64xf32> to vector<2x16xf32>
    %cst_180 = arith.constant 5.000000e-01 : f32
    %472 = vector.broadcast %cst_180 : f32 to vector<2x16xf32>
    %473 = arith.mulf %472, %471 : vector<2x16xf32>
    %474 = math.tanh %473 : vector<2x16xf32>
    %cst_181 = arith.constant 5.000000e-01 : f32
    %475 = vector.broadcast %cst_181 : f32 to vector<2x16xf32>
    %476 = arith.mulf %475, %474 : vector<2x16xf32>
    %cst_182 = arith.constant 5.000000e-01 : f32
    %477 = vector.broadcast %cst_182 : f32 to vector<2x16xf32>
    %478 = arith.addf %476, %477 : vector<2x16xf32>
    %479 = vector.extract_strided_slice %431 {offsets = [0, 32], sizes = [2, 16], strides = [1, 1]} : vector<2x64xf32> to vector<2x16xf32>
    %480 = math.tanh %479 : vector<2x16xf32>
    %481 = vector.extract_strided_slice %431 {offsets = [0, 48], sizes = [2, 16], strides = [1, 1]} : vector<2x64xf32> to vector<2x16xf32>
    %cst_183 = arith.constant 5.000000e-01 : f32
    %482 = vector.broadcast %cst_183 : f32 to vector<2x16xf32>
    %483 = arith.mulf %482, %481 : vector<2x16xf32>
    %484 = math.tanh %483 : vector<2x16xf32>
    %cst_184 = arith.constant 5.000000e-01 : f32
    %485 = vector.broadcast %cst_184 : f32 to vector<2x16xf32>
    %486 = arith.mulf %485, %484 : vector<2x16xf32>
    %cst_185 = arith.constant 5.000000e-01 : f32
    %487 = vector.broadcast %cst_185 : f32 to vector<2x16xf32>
    %488 = arith.addf %486, %487 : vector<2x16xf32>
    %489 = arith.mulf %478, %410 : vector<2x16xf32>
    %490 = arith.mulf %470, %480 : vector<2x16xf32>
    %491 = arith.addf %489, %490 : vector<2x16xf32>
    %492 = math.tanh %491 : vector<2x16xf32>
    %493 = arith.mulf %488, %492 : vector<2x16xf32>
    %494 = arith.index_cast %c5_i32 : i32 to index
    %c0_186 = arith.constant 0 : index
    %c0_187 = arith.constant 0 : index
    %495 = vector.load %arg12[%494, %c0_186, %c0_187] : memref<8x2x16xf32, #tpu.memory_space<vmem>>, vector<1x2x16xf32>
    %496 = vector.shape_cast %495 : vector<1x2x16xf32> to vector<2x16xf32>
    %497 = vector.shape_cast %462 : vector<2x16xf32> to vector<1x2x16xf32>
    tpu.vector_store %arg12[%494, %c0_186, %c0_187], %497 {strides = array<i32>} : memref<8x2x16xf32, #tpu.memory_space<vmem>>, vector<1x2x16xf32>,
    %498 = arith.index_cast %421 : i32 to index
    %c0_188 = arith.constant 0 : index
    %c0_189 = arith.constant 0 : index
    %499 = vector.load %arg13[%498, %c0_188, %c0_189] : memref<8x2x16xf32, #tpu.memory_space<vmem>>, vector<1x2x16xf32>
    %500 = vector.shape_cast %499 : vector<1x2x16xf32> to vector<2x16xf32>
    %501 = vector.shape_cast %493 : vector<2x16xf32> to vector<1x2x16xf32>
    tpu.vector_store %arg13[%498, %c0_188, %c0_189], %501 {strides = array<i32>} : memref<8x2x16xf32, #tpu.memory_space<vmem>>, vector<1x2x16xf32>,
    %c6_i32 = arith.constant 6 : i32
    %c7_i32_190 = arith.constant 7 : i32
    %502 = arith.subi %c7_i32_190, %c6_i32 : i32
    %503 = arith.index_cast %c6_i32 : i32 to index
    %c0_191 = arith.constant 0 : index
    %c0_192 = arith.constant 0 : index
    %504 = vector.load %arg10[%503, %c0_191, %c0_192] : memref<8x2x64xf32, #tpu.memory_space<vmem>>, vector<1x2x64xf32>
    %505 = vector.shape_cast %504 : vector<1x2x64xf32> to vector<2x64xf32>
    %cst_193 = arith.constant dense<0.000000e+00> : vector<2x64xf32>
    %506 = tpu.matmul %462, %13, %cst_193 {dimension_numbers = #tpu.dot_dimension_numbers<[1], [0], [0], [1], [0, 0, 1, 1], [], []>} : vector<2x16xf32>, vector<16x64xf32>, vector<2x64xf32> -> vector<2x64xf32>
    %507 = arith.addf %505, %506 : vector<2x64xf32>
    %508 = arith.index_cast %502 : i32 to index
    %c0_194 = arith.constant 0 : index
    %c0_195 = arith.constant 0 : index
    %509 = vector.load %arg11[%508, %c0_194, %c0_195] : memref<8x2x64xf32, #tpu.memory_space<vmem>>, vector<1x2x64xf32>
    %510 = vector.shape_cast %509 : vector<1x2x64xf32> to vector<2x64xf32>
    %cst_196 = arith.constant dense<0.000000e+00> : vector<2x64xf32>
    %511 = tpu.matmul %493, %14, %cst_196 {dimension_numbers = #tpu.dot_dimension_numbers<[1], [0], [0], [1], [0, 0, 1, 1], [], []>} : vector<2x16xf32>, vector<16x64xf32>, vector<2x64xf32> -> vector<2x64xf32>
    %512 = arith.addf %510, %511 : vector<2x64xf32>
    %513 = vector.extract_strided_slice %507 {offsets = [0, 0], sizes = [2, 16], strides = [1, 1]} : vector<2x64xf32> to vector<2x16xf32>
    %cst_197 = arith.constant 5.000000e-01 : f32
    %514 = vector.broadcast %cst_197 : f32 to vector<2x16xf32>
    %515 = arith.mulf %514, %513 : vector<2x16xf32>
    %516 = math.tanh %515 : vector<2x16xf32>
    %cst_198 = arith.constant 5.000000e-01 : f32
    %517 = vector.broadcast %cst_198 : f32 to vector<2x16xf32>
    %518 = arith.mulf %517, %516 : vector<2x16xf32>
    %cst_199 = arith.constant 5.000000e-01 : f32
    %519 = vector.broadcast %cst_199 : f32 to vector<2x16xf32>
    %520 = arith.addf %518, %519 : vector<2x16xf32>
    %521 = vector.extract_strided_slice %507 {offsets = [0, 16], sizes = [2, 16], strides = [1, 1]} : vector<2x64xf32> to vector<2x16xf32>
    %cst_200 = arith.constant 5.000000e-01 : f32
    %522 = vector.broadcast %cst_200 : f32 to vector<2x16xf32>
    %523 = arith.mulf %522, %521 : vector<2x16xf32>
    %524 = math.tanh %523 : vector<2x16xf32>
    %cst_201 = arith.constant 5.000000e-01 : f32
    %525 = vector.broadcast %cst_201 : f32 to vector<2x16xf32>
    %526 = arith.mulf %525, %524 : vector<2x16xf32>
    %cst_202 = arith.constant 5.000000e-01 : f32
    %527 = vector.broadcast %cst_202 : f32 to vector<2x16xf32>
    %528 = arith.addf %526, %527 : vector<2x16xf32>
    %529 = vector.extract_strided_slice %507 {offsets = [0, 32], sizes = [2, 16], strides = [1, 1]} : vector<2x64xf32> to vector<2x16xf32>
    %530 = math.tanh %529 : vector<2x16xf32>
    %531 = vector.extract_strided_slice %507 {offsets = [0, 48], sizes = [2, 16], strides = [1, 1]} : vector<2x64xf32> to vector<2x16xf32>
    %cst_203 = arith.constant 5.000000e-01 : f32
    %532 = vector.broadcast %cst_203 : f32 to vector<2x16xf32>
    %533 = arith.mulf %532, %531 : vector<2x16xf32>
    %534 = math.tanh %533 : vector<2x16xf32>
    %cst_204 = arith.constant 5.000000e-01 : f32
    %535 = vector.broadcast %cst_204 : f32 to vector<2x16xf32>
    %536 = arith.mulf %535, %534 : vector<2x16xf32>
    %cst_205 = arith.constant 5.000000e-01 : f32
    %537 = vector.broadcast %cst_205 : f32 to vector<2x16xf32>
    %538 = arith.addf %536, %537 : vector<2x16xf32>
    %539 = arith.mulf %528, %460 : vector<2x16xf32>
    %540 = arith.mulf %520, %530 : vector<2x16xf32>
    %541 = arith.addf %539, %540 : vector<2x16xf32>
    %542 = math.tanh %541 : vector<2x16xf32>
    %543 = arith.mulf %538, %542 : vector<2x16xf32>
    %544 = vector.extract_strided_slice %512 {offsets = [0, 0], sizes = [2, 16], strides = [1, 1]} : vector<2x64xf32> to vector<2x16xf32>
    %cst_206 = arith.constant 5.000000e-01 : f32
    %545 = vector.broadcast %cst_206 : f32 to vector<2x16xf32>
    %546 = arith.mulf %545, %544 : vector<2x16xf32>
    %547 = math.tanh %546 : vector<2x16xf32>
    %cst_207 = arith.constant 5.000000e-01 : f32
    %548 = vector.broadcast %cst_207 : f32 to vector<2x16xf32>
    %549 = arith.mulf %548, %547 : vector<2x16xf32>
    %cst_208 = arith.constant 5.000000e-01 : f32
    %550 = vector.broadcast %cst_208 : f32 to vector<2x16xf32>
    %551 = arith.addf %549, %550 : vector<2x16xf32>
    %552 = vector.extract_strided_slice %512 {offsets = [0, 16], sizes = [2, 16], strides = [1, 1]} : vector<2x64xf32> to vector<2x16xf32>
    %cst_209 = arith.constant 5.000000e-01 : f32
    %553 = vector.broadcast %cst_209 : f32 to vector<2x16xf32>
    %554 = arith.mulf %553, %552 : vector<2x16xf32>
    %555 = math.tanh %554 : vector<2x16xf32>
    %cst_210 = arith.constant 5.000000e-01 : f32
    %556 = vector.broadcast %cst_210 : f32 to vector<2x16xf32>
    %557 = arith.mulf %556, %555 : vector<2x16xf32>
    %cst_211 = arith.constant 5.000000e-01 : f32
    %558 = vector.broadcast %cst_211 : f32 to vector<2x16xf32>
    %559 = arith.addf %557, %558 : vector<2x16xf32>
    %560 = vector.extract_strided_slice %512 {offsets = [0, 32], sizes = [2, 16], strides = [1, 1]} : vector<2x64xf32> to vector<2x16xf32>
    %561 = math.tanh %560 : vector<2x16xf32>
    %562 = vector.extract_strided_slice %512 {offsets = [0, 48], sizes = [2, 16], strides = [1, 1]} : vector<2x64xf32> to vector<2x16xf32>
    %cst_212 = arith.constant 5.000000e-01 : f32
    %563 = vector.broadcast %cst_212 : f32 to vector<2x16xf32>
    %564 = arith.mulf %563, %562 : vector<2x16xf32>
    %565 = math.tanh %564 : vector<2x16xf32>
    %cst_213 = arith.constant 5.000000e-01 : f32
    %566 = vector.broadcast %cst_213 : f32 to vector<2x16xf32>
    %567 = arith.mulf %566, %565 : vector<2x16xf32>
    %cst_214 = arith.constant 5.000000e-01 : f32
    %568 = vector.broadcast %cst_214 : f32 to vector<2x16xf32>
    %569 = arith.addf %567, %568 : vector<2x16xf32>
    %570 = arith.mulf %559, %491 : vector<2x16xf32>
    %571 = arith.mulf %551, %561 : vector<2x16xf32>
    %572 = arith.addf %570, %571 : vector<2x16xf32>
    %573 = math.tanh %572 : vector<2x16xf32>
    %574 = arith.mulf %569, %573 : vector<2x16xf32>
    %575 = arith.index_cast %c6_i32 : i32 to index
    %c0_215 = arith.constant 0 : index
    %c0_216 = arith.constant 0 : index
    %576 = vector.load %arg12[%575, %c0_215, %c0_216] : memref<8x2x16xf32, #tpu.memory_space<vmem>>, vector<1x2x16xf32>
    %577 = vector.shape_cast %576 : vector<1x2x16xf32> to vector<2x16xf32>
    %578 = vector.shape_cast %543 : vector<2x16xf32> to vector<1x2x16xf32>
    tpu.vector_store %arg12[%575, %c0_215, %c0_216], %578 {strides = array<i32>} : memref<8x2x16xf32, #tpu.memory_space<vmem>>, vector<1x2x16xf32>,
    %579 = arith.index_cast %502 : i32 to index
    %c0_217 = arith.constant 0 : index
    %c0_218 = arith.constant 0 : index
    %580 = vector.load %arg13[%579, %c0_217, %c0_218] : memref<8x2x16xf32, #tpu.memory_space<vmem>>, vector<1x2x16xf32>
    %581 = vector.shape_cast %580 : vector<1x2x16xf32> to vector<2x16xf32>
    %582 = vector.shape_cast %574 : vector<2x16xf32> to vector<1x2x16xf32>
    tpu.vector_store %arg13[%579, %c0_217, %c0_218], %582 {strides = array<i32>} : memref<8x2x16xf32, #tpu.memory_space<vmem>>, vector<1x2x16xf32>,
    %c7_i32_219 = arith.constant 7 : i32
    %c7_i32_220 = arith.constant 7 : i32
    %583 = arith.subi %c7_i32_220, %c7_i32_219 : i32
    %584 = arith.index_cast %c7_i32_219 : i32 to index
    %c0_221 = arith.constant 0 : index
    %c0_222 = arith.constant 0 : index
    %585 = vector.load %arg10[%584, %c0_221, %c0_222] : memref<8x2x64xf32, #tpu.memory_space<vmem>>, vector<1x2x64xf32>
    %586 = vector.shape_cast %585 : vector<1x2x64xf32> to vector<2x64xf32>
    %cst_223 = arith.constant dense<0.000000e+00> : vector<2x64xf32>
    %587 = tpu.matmul %543, %13, %cst_223 {dimension_numbers = #tpu.dot_dimension_numbers<[1], [0], [0], [1], [0, 0, 1, 1], [], []>} : vector<2x16xf32>, vector<16x64xf32>, vector<2x64xf32> -> vector<2x64xf32>
    %588 = arith.addf %586, %587 : vector<2x64xf32>
    %589 = arith.index_cast %583 : i32 to index
    %c0_224 = arith.constant 0 : index
    %c0_225 = arith.constant 0 : index
    %590 = vector.load %arg11[%589, %c0_224, %c0_225] : memref<8x2x64xf32, #tpu.memory_space<vmem>>, vector<1x2x64xf32>
    %591 = vector.shape_cast %590 : vector<1x2x64xf32> to vector<2x64xf32>
    %cst_226 = arith.constant dense<0.000000e+00> : vector<2x64xf32>
    %592 = tpu.matmul %574, %14, %cst_226 {dimension_numbers = #tpu.dot_dimension_numbers<[1], [0], [0], [1], [0, 0, 1, 1], [], []>} : vector<2x16xf32>, vector<16x64xf32>, vector<2x64xf32> -> vector<2x64xf32>
    %593 = arith.addf %591, %592 : vector<2x64xf32>
    %594 = vector.extract_strided_slice %588 {offsets = [0, 0], sizes = [2, 16], strides = [1, 1]} : vector<2x64xf32> to vector<2x16xf32>
    %cst_227 = arith.constant 5.000000e-01 : f32
    %595 = vector.broadcast %cst_227 : f32 to vector<2x16xf32>
    %596 = arith.mulf %595, %594 : vector<2x16xf32>
    %597 = math.tanh %596 : vector<2x16xf32>
    %cst_228 = arith.constant 5.000000e-01 : f32
    %598 = vector.broadcast %cst_228 : f32 to vector<2x16xf32>
    %599 = arith.mulf %598, %597 : vector<2x16xf32>
    %cst_229 = arith.constant 5.000000e-01 : f32
    %600 = vector.broadcast %cst_229 : f32 to vector<2x16xf32>
    %601 = arith.addf %599, %600 : vector<2x16xf32>
    %602 = vector.extract_strided_slice %588 {offsets = [0, 16], sizes = [2, 16], strides = [1, 1]} : vector<2x64xf32> to vector<2x16xf32>
    %cst_230 = arith.constant 5.000000e-01 : f32
    %603 = vector.broadcast %cst_230 : f32 to vector<2x16xf32>
    %604 = arith.mulf %603, %602 : vector<2x16xf32>
    %605 = math.tanh %604 : vector<2x16xf32>
    %cst_231 = arith.constant 5.000000e-01 : f32
    %606 = vector.broadcast %cst_231 : f32 to vector<2x16xf32>
    %607 = arith.mulf %606, %605 : vector<2x16xf32>
    %cst_232 = arith.constant 5.000000e-01 : f32
    %608 = vector.broadcast %cst_232 : f32 to vector<2x16xf32>
    %609 = arith.addf %607, %608 : vector<2x16xf32>
    %610 = vector.extract_strided_slice %588 {offsets = [0, 32], sizes = [2, 16], strides = [1, 1]} : vector<2x64xf32> to vector<2x16xf32>
    %611 = math.tanh %610 : vector<2x16xf32>
    %612 = vector.extract_strided_slice %588 {offsets = [0, 48], sizes = [2, 16], strides = [1, 1]} : vector<2x64xf32> to vector<2x16xf32>
    %cst_233 = arith.constant 5.000000e-01 : f32
    %613 = vector.broadcast %cst_233 : f32 to vector<2x16xf32>
    %614 = arith.mulf %613, %612 : vector<2x16xf32>
    %615 = math.tanh %614 : vector<2x16xf32>
    %cst_234 = arith.constant 5.000000e-01 : f32
    %616 = vector.broadcast %cst_234 : f32 to vector<2x16xf32>
    %617 = arith.mulf %616, %615 : vector<2x16xf32>
    %cst_235 = arith.constant 5.000000e-01 : f32
    %618 = vector.broadcast %cst_235 : f32 to vector<2x16xf32>
    %619 = arith.addf %617, %618 : vector<2x16xf32>
    %620 = arith.mulf %609, %541 : vector<2x16xf32>
    %621 = arith.mulf %601, %611 : vector<2x16xf32>
    %622 = arith.addf %620, %621 : vector<2x16xf32>
    %623 = math.tanh %622 : vector<2x16xf32>
    %624 = arith.mulf %619, %623 : vector<2x16xf32>
    %625 = vector.extract_strided_slice %593 {offsets = [0, 0], sizes = [2, 16], strides = [1, 1]} : vector<2x64xf32> to vector<2x16xf32>
    %cst_236 = arith.constant 5.000000e-01 : f32
    %626 = vector.broadcast %cst_236 : f32 to vector<2x16xf32>
    %627 = arith.mulf %626, %625 : vector<2x16xf32>
    %628 = math.tanh %627 : vector<2x16xf32>
    %cst_237 = arith.constant 5.000000e-01 : f32
    %629 = vector.broadcast %cst_237 : f32 to vector<2x16xf32>
    %630 = arith.mulf %629, %628 : vector<2x16xf32>
    %cst_238 = arith.constant 5.000000e-01 : f32
    %631 = vector.broadcast %cst_238 : f32 to vector<2x16xf32>
    %632 = arith.addf %630, %631 : vector<2x16xf32>
    %633 = vector.extract_strided_slice %593 {offsets = [0, 16], sizes = [2, 16], strides = [1, 1]} : vector<2x64xf32> to vector<2x16xf32>
    %cst_239 = arith.constant 5.000000e-01 : f32
    %634 = vector.broadcast %cst_239 : f32 to vector<2x16xf32>
    %635 = arith.mulf %634, %633 : vector<2x16xf32>
    %636 = math.tanh %635 : vector<2x16xf32>
    %cst_240 = arith.constant 5.000000e-01 : f32
    %637 = vector.broadcast %cst_240 : f32 to vector<2x16xf32>
    %638 = arith.mulf %637, %636 : vector<2x16xf32>
    %cst_241 = arith.constant 5.000000e-01 : f32
    %639 = vector.broadcast %cst_241 : f32 to vector<2x16xf32>
    %640 = arith.addf %638, %639 : vector<2x16xf32>
    %641 = vector.extract_strided_slice %593 {offsets = [0, 32], sizes = [2, 16], strides = [1, 1]} : vector<2x64xf32> to vector<2x16xf32>
    %642 = math.tanh %641 : vector<2x16xf32>
    %643 = vector.extract_strided_slice %593 {offsets = [0, 48], sizes = [2, 16], strides = [1, 1]} : vector<2x64xf32> to vector<2x16xf32>
    %cst_242 = arith.constant 5.000000e-01 : f32
    %644 = vector.broadcast %cst_242 : f32 to vector<2x16xf32>
    %645 = arith.mulf %644, %643 : vector<2x16xf32>
    %646 = math.tanh %645 : vector<2x16xf32>
    %cst_243 = arith.constant 5.000000e-01 : f32
    %647 = vector.broadcast %cst_243 : f32 to vector<2x16xf32>
    %648 = arith.mulf %647, %646 : vector<2x16xf32>
    %cst_244 = arith.constant 5.000000e-01 : f32
    %649 = vector.broadcast %cst_244 : f32 to vector<2x16xf32>
    %650 = arith.addf %648, %649 : vector<2x16xf32>
    %651 = arith.mulf %640, %572 : vector<2x16xf32>
    %652 = arith.mulf %632, %642 : vector<2x16xf32>
    %653 = arith.addf %651, %652 : vector<2x16xf32>
    %654 = math.tanh %653 : vector<2x16xf32>
    %655 = arith.mulf %650, %654 : vector<2x16xf32>
    %656 = arith.index_cast %c7_i32_219 : i32 to index
    %c0_245 = arith.constant 0 : index
    %c0_246 = arith.constant 0 : index
    %657 = vector.load %arg12[%656, %c0_245, %c0_246] : memref<8x2x16xf32, #tpu.memory_space<vmem>>, vector<1x2x16xf32>
    %658 = vector.shape_cast %657 : vector<1x2x16xf32> to vector<2x16xf32>
    %659 = vector.shape_cast %624 : vector<2x16xf32> to vector<1x2x16xf32>
    tpu.vector_store %arg12[%656, %c0_245, %c0_246], %659 {strides = array<i32>} : memref<8x2x16xf32, #tpu.memory_space<vmem>>, vector<1x2x16xf32>,
    %660 = arith.index_cast %583 : i32 to index
    %c0_247 = arith.constant 0 : index
    %c0_248 = arith.constant 0 : index
    %661 = vector.load %arg13[%660, %c0_247, %c0_248] : memref<8x2x16xf32, #tpu.memory_space<vmem>>, vector<1x2x16xf32>
    %662 = vector.shape_cast %661 : vector<1x2x16xf32> to vector<2x16xf32>
    %663 = vector.shape_cast %655 : vector<2x16xf32> to vector<1x2x16xf32>
    tpu.vector_store %arg13[%660, %c0_247, %c0_248], %663 {strides = array<i32>} : memref<8x2x16xf32, #tpu.memory_space<vmem>>, vector<1x2x16xf32>,
    %c8_i32 = arith.constant 8 : i32
    %c0_249 = arith.constant 0 : index
    %c0_250 = arith.constant 0 : index
    %c0_251 = arith.constant 0 : index
    %664 = vector.load %arg12[%c0_249, %c0_250, %c0_251] : memref<8x2x16xf32, #tpu.memory_space<vmem>>, vector<8x2x16xf32>
    %665 = vector.shape_cast %664 : vector<8x2x16xf32> to vector<16x16xf32>
    %c0_252 = arith.constant 0 : index
    %c0_253 = arith.constant 0 : index
    %c0_254 = arith.constant 0 : index
    %666 = vector.load %arg13[%c0_252, %c0_253, %c0_254] : memref<8x2x16xf32, #tpu.memory_space<vmem>>, vector<8x2x16xf32>
    %667 = vector.shape_cast %666 : vector<8x2x16xf32> to vector<16x16xf32>
    %c0_255 = arith.constant 0 : index
    %c0_256 = arith.constant 0 : index
    %668 = vector.load %arg6[%c0_255, %c0_256] : memref<16x128xf32, #tpu.memory_space<vmem>>, vector<16x128xf32>
    %cst_257 = arith.constant dense<0.000000e+00> : vector<16x128xf32>
    %669 = tpu.matmul %665, %668, %cst_257 {dimension_numbers = #tpu.dot_dimension_numbers<[1], [0], [0], [1], [0, 0, 1, 1], [], []>} : vector<16x16xf32>, vector<16x128xf32>, vector<16x128xf32> -> vector<16x128xf32>
    %c0_258 = arith.constant 0 : index
    %c0_259 = arith.constant 0 : index
    %670 = vector.load %arg7[%c0_258, %c0_259] : memref<16x128xf32, #tpu.memory_space<vmem>>, vector<16x128xf32>
    %cst_260 = arith.constant dense<0.000000e+00> : vector<16x128xf32>
    %671 = tpu.matmul %667, %670, %cst_260 {dimension_numbers = #tpu.dot_dimension_numbers<[1], [0], [0], [1], [0, 0, 1, 1], [], []>} : vector<16x16xf32>, vector<16x128xf32>, vector<16x128xf32> -> vector<16x128xf32>
    %672 = arith.addf %669, %671 : vector<16x128xf32>
    %c0_261 = arith.constant 0 : index
    %c0_262 = arith.constant 0 : index
    %673 = vector.load %arg8[%c0_261, %c0_262] : memref<1x128xf32, #tpu.memory_space<vmem>>, vector<1x128xf32>
    %674 = vector.broadcast %673 : vector<1x128xf32> to vector<16x128xf32>
    %675 = arith.addf %672, %674 : vector<16x128xf32>
    %676 = vector.shape_cast %675 : vector<16x128xf32> to vector<8x2x128xf32>
    %c0_263 = arith.constant 0 : index
    %c0_264 = arith.constant 0 : index
    %c0_265 = arith.constant 0 : index
    %677 = vector.load %arg9[%c0_263, %c0_264, %c0_265] : memref<8x2x128xf32, #tpu.memory_space<vmem>>, vector<8x2x128xf32>
    tpu.vector_store %arg9[%c0_263, %c0_264, %c0_265], %676 {strides = array<i32>} : memref<8x2x128xf32, #tpu.memory_space<vmem>>, vector<8x2x128xf32>,
    return
  }
  func.func @transform_0(%arg0: i32) -> (i32, i32, i32) {
    %c0_i32 = arith.constant 0 : i32
    %c0_i32_0 = arith.constant 0 : i32
    %c0_i32_1 = arith.constant 0 : i32
    return %c0_i32, %arg0, %c0_i32_0 : i32, i32, i32
  }
  func.func @transform_1(%arg0: i32) -> (i32, i32) {
    %c0_i32 = arith.constant 0 : i32
    %c0_i32_0 = arith.constant 0 : i32
    %c0_i32_1 = arith.constant 0 : i32
    return %c0_i32, %c0_i32_0 : i32, i32
  }
  func.func @transform_2(%arg0: i32) -> (i32, i32) {
    %c0_i32 = arith.constant 0 : i32
    %c0_i32_0 = arith.constant 0 : i32
    %c0_i32_1 = arith.constant 0 : i32
    return %c0_i32, %c0_i32_0 : i32, i32
  }
  func.func @transform_3(%arg0: i32) -> (i32, i32) {
    %c0_i32 = arith.constant 0 : i32
    %c0_i32_0 = arith.constant 0 : i32
    %c0_i32_1 = arith.constant 0 : i32
    return %c0_i32, %c0_i32_0 : i32, i32
  }
  func.func @transform_4(%arg0: i32) -> (i32, i32) {
    %c0_i32 = arith.constant 0 : i32
    %c0_i32_0 = arith.constant 0 : i32
    %c0_i32_1 = arith.constant 0 : i32
    return %c0_i32, %c0_i32_0 : i32, i32
  }
  func.func @transform_5(%arg0: i32) -> (i32, i32) {
    %c0_i32 = arith.constant 0 : i32
    %c0_i32_0 = arith.constant 0 : i32
    %c0_i32_1 = arith.constant 0 : i32
    return %c0_i32, %c0_i32_0 : i32, i32
  }
  func.func @transform_6(%arg0: i32) -> (i32, i32) {
    %c0_i32 = arith.constant 0 : i32
    %c0_i32_0 = arith.constant 0 : i32
    %c0_i32_1 = arith.constant 0 : i32
    return %c0_i32, %c0_i32_0 : i32, i32
  }
  func.func @transform_7(%arg0: i32) -> (i32, i32) {
    %c0_i32 = arith.constant 0 : i32
    %c0_i32_0 = arith.constant 0 : i32
    %c0_i32_1 = arith.constant 0 : i32
    return %c0_i32, %c0_i32_0 : i32, i32
  }
  func.func @transform_8(%arg0: i32) -> (i32, i32, i32) {
    %c0_i32 = arith.constant 0 : i32
    %c0_i32_0 = arith.constant 0 : i32
    %c0_i32_1 = arith.constant 0 : i32
    return %c0_i32, %arg0, %c0_i32_0 : i32, i32, i32
  }
}

</mosaic_0001>

<bundles_post_ra>
// kernel: tpu_custom_call.1
= control target key start
LH: loop header
LB: loop body
LE: loop exit
PB: predicated region body
PF: predicated region fallthrough
CT: control target
= control target key end

     0   :  { %13 = vsyncpa [#allocation7], 0  ;;  %s3347_s0 = inlined_call_operand.hbm [shape: f32[8,2,32], index: 0, kind: input, shape index: {}]   ;;  %s3348_s1 = inlined_call_operand.hbm [shape: f32[32,128], index: 1, kind: input, shape index: {}]   ;;  %s3349_s2 = inlined_call_operand.hbm [shape: f32[16,64], index: 2, kind: input, shape index: {}]   ;;  %s3350_s3 = inlined_call_operand.hbm [shape: f32[16,64], index: 3, kind: input, shape index: {}]   ;;  %s3351_s4 = inlined_call_operand.vmem [shape: f32[1,128], index: 4, kind: input, shape index: {}]   ;;  %s3352_s5 = inlined_call_operand.vmem [shape: f32[16,128], index: 5, kind: input, shape index: {}]   ;;  %s3353_s6 = inlined_call_operand.hbm [shape: f32[16,128], index: 6, kind: input, shape index: {}]   ;;  %s3354_s7 = inlined_call_operand.vmem [shape: f32[1,128], index: 7, kind: input, shape index: {}]   ;;  %s3355_s8 = inlined_call_operand.hbm [shape: f32[8,2,128], index: 8, kind: output, shape index: {}]  }
   0x1   :  { %14 = vsyncpa [#allocation10], 0 }
   0x2   :  { %15 = vsyncpa [#allocation13], 0 }
   0x3   :  { %16 = vsyncpa [#allocation8], 0  ;;  %s2916_s27 = smov [#allocation9]   ;;  %s2776_s9 = scalar_lea.hbm %s3348_s1, 512 }
   0x4   :  { %s34_s28 = sshll.u32 %s2916_s27, 4  ;;  %p2777_p0 = scmp.ne.s32.totalorder %s3348_s1, %s2776_s9  ;;  %s35_s28 = int_to_ptr.vmem [resolvable:$true] %s34_s28 }
   0x5   :  { %p2780_p1 = scmp.lt.u32.totalorder %s2776_s9, %s3348_s1 }
   0x7   :  { %p2782_p2 = pnand %p2780_p1, %p2777_p0 }
   0x9   :  { %2785 = shalt.err (!%p2782_p2)
}
   0xa   :  { %s2786_s14 = scalar_lea.vmem %s35_s28, 512  ;;  %p2791_p4 = scmp.lt.s32.totalorder %s35_s28, %s35_s28 }
   0xb   :  { %p2787_p3 = scmp.ne.s32.totalorder %s35_s28, %s2786_s14  ;;  %p2792_p5 = scmp.lt.s32.totalorder %s2786_s14, %s2786_s14 }
   0xd   :  { %p2793_p6 = por %p2792_p5, %p2791_p4 }
   0xf   :  { %p2794_p7 = pnand %p2793_p6, %p2787_p3 }
  0x11   :  { %2797 = shalt.err (!%p2794_p7)
}
  0x12   :  { %s2917_s15 = smov 128   ;;  %s2918_s16 = smov 8  }
  0x13   :  { %40 = dma.hbm_to_vmem [thread:$0]  %s3348_s1, 512, %s35_s28, [#allocation10], %s2917_s15, %s2917_s15, %s2918_s16  }
  0x14   :  { %s2919_s19 = smov [#allocation12]   ;;  %s2920_s21 = smov [#allocation6]  }
  0x15   :  { %s58_s20 = sshll.u32 %s2919_s19, 4  ;;  %s22_s22 = sshll.u32 %s2920_s21, 4  ;;  %s59_s20 = int_to_ptr.vmem [resolvable:$true] %s58_s20  ;;  %s23_s22 = int_to_ptr.vmem [resolvable:$true] %s22_s22 }
  0x16   :  { %s2798_s25 = scalar_lea.hbm %s3350_s3, 256 }
  0x17   :  { %p2799_p8 = scmp.ne.s32.totalorder %s3350_s3, %s2798_s25  ;;  %p2802_p9 = scmp.lt.u32.totalorder %s2798_s25, %s3350_s3 }
  0x19   :  { %p2804_p10 = pnand %p2802_p9, %p2799_p8 }
  0x1b   :  { %2807 = shalt.err (!%p2804_p10)
}
  0x1c   :  { %s2808_s1 = scalar_lea.vmem %s59_s20, 256  ;;  %p2813_p12 = scmp.lt.s32.totalorder %s59_s20, %s59_s20 }
  0x1d   :  { %p2809_p11 = scmp.ne.s32.totalorder %s59_s20, %s2808_s1  ;;  %p2814_p13 = scmp.lt.s32.totalorder %s2808_s1, %s2808_s1 }
  0x1f   :  { %p2815_p0 = por %p2814_p13, %p2813_p12 }
  0x21   :  { %p2816_p1 = pnand %p2815_p0, %p2809_p11 }
  0x23   :  { %2819 = shalt.err (!%p2816_p1)
}
  0x24   :  { %64 = dma.hbm_to_vmem [thread:$0]  %s3350_s3, 256, %s59_s20, [#allocation13], %s2917_s15, %s2917_s15, %s2918_s16  }
  0x25   :  { %s2820_s12 = scalar_lea.hbm %s3347_s0, 256 }
  0x26   :  { %p2821_p2 = scmp.ne.s32.totalorder %s3347_s0, %s2820_s12  ;;  %p2824_p3 = scmp.lt.u32.totalorder %s2820_s12, %s3347_s0 }
  0x28   :  { %p2826_p4 = pnand %p2824_p3, %p2821_p2 }
  0x2a   :  { %2829 = shalt.err (!%p2826_p4)
}
  0x2b   :  { %s2830_s19 = scalar_lea.vmem %s23_s22, 256  ;;  %p2835_p6 = scmp.lt.s32.totalorder %s23_s22, %s23_s22 }
  0x2c   :  { %p2831_p5 = scmp.ne.s32.totalorder %s23_s22, %s2830_s19  ;;  %p2836_p7 = scmp.lt.s32.totalorder %s2830_s19, %s2830_s19 }
  0x2e   :  { %p2837_p8 = por %p2836_p7, %p2835_p6 }
  0x30   :  { %p2838_p9 = pnand %p2837_p8, %p2831_p5 }
  0x32   :  { %2841 = shalt.err (!%p2838_p9)
}
  0x33   :  { %s2921_s3 = smov 32   ;;  %s2922_s20 = smov 2  }
  0x34   :  { %28 = dma.hbm_to_vmem [thread:$0]  %s3347_s0, 256, %s23_s22, [#allocation7], %s2921_s3, %s2921_s3, %s2922_s20  }
  0x35   :  { %s2923_s24 = smov [#allocation11]   ;;  %s2924_s26 = smov [#allocation14]  }
  0x36   :  { %s46_s25 = sshll.u32 %s2923_s24, 4  ;;  %s74_s27 = sshll.u32 %s2924_s26, 4  ;;  %s47_s25 = int_to_ptr.vmem [resolvable:$true] %s46_s25  ;;  %s75_s27 = int_to_ptr.vmem [resolvable:$true] %s74_s27 }
  0x37   :  { %s2842_s1 = scalar_lea.hbm %s3349_s2, 256 }
  0x38   :  { %p2843_p10 = scmp.ne.s32.totalorder %s3349_s2, %s2842_s1  ;;  %p2846_p11 = scmp.lt.u32.totalorder %s2842_s1, %s3349_s2 }
  0x3a   :  { %p2848_p12 = pnand %p2846_p11, %p2843_p10 }
  0x3c   :  { %2851 = shalt.err (!%p2848_p12)
}
  0x3d   :  { %s2852_s0 = scalar_lea.vmem %s47_s25, 256  ;;  %p2857_p0 = scmp.lt.s32.totalorder %s47_s25, %s47_s25 }
  0x3e   :  { %p2853_p13 = scmp.ne.s32.totalorder %s47_s25, %s2852_s0  ;;  %p2858_p1 = scmp.lt.s32.totalorder %s2852_s0, %s2852_s0 }
  0x40   :  { %p2859_p2 = por %p2858_p1, %p2857_p0 }
  0x42   :  { %p2860_p3 = pnand %p2859_p2, %p2853_p13 }
  0x44   :  { %2863 = shalt.err (!%p2860_p3)
}
  0x45   :  { %52 = dma.hbm_to_vmem [thread:$0]  %s3349_s2, 256, %s47_s25, [#allocation10], %s2917_s15, %s2917_s15, %s2918_s16  }
  0x46   :  { %s2864_s17 = scalar_lea.hbm %s3353_s6, 256 }
  0x47   :  { %p2865_p4 = scmp.ne.s32.totalorder %s3353_s6, %s2864_s17  ;;  %p2868_p5 = scmp.lt.u32.totalorder %s2864_s17, %s3353_s6 }
  0x49   :  { %p2870_p6 = pnand %p2868_p5, %p2865_p4 }
  0x4b   :  { %2873 = shalt.err (!%p2870_p6)
}
  0x4c   :  { %s2874_s24 = scalar_lea.vmem %s75_s27, 256  ;;  %p2879_p8 = scmp.lt.s32.totalorder %s75_s27, %s75_s27 }
  0x4d   :  { %p2875_p7 = scmp.ne.s32.totalorder %s75_s27, %s2874_s24  ;;  %p2880_p9 = scmp.lt.s32.totalorder %s2874_s24, %s2874_s24 }
  0x4f   :  { %p2881_p10 = por %p2880_p9, %p2879_p8 }
  0x51   :  { %p2882_p11 = pnand %p2881_p10, %p2875_p7 }
  0x53   :  { %2885 = shalt.err (!%p2882_p11)
}
  0x54   :  { %80 = dma.hbm_to_vmem [thread:$0]  %s3353_s6, 256, %s75_s27, [#allocation13], %s2917_s15, %s2917_s15, %s2918_s16  }
  0x55   :  { %2908 = dma.done.wait [#allocation7], 256  }
  0x56   :  { %2909 = vsyncadd [#allocation7], 4294967040 }
  0x57   :  { %2910 = dma.done.wait [#allocation10], 768  }
  0x58   :  { %2911 = vsyncadd [#allocation10], 4294966528 }
  0x59   :  { %2912 = dma.done.wait [#allocation13], 512  }
  0x5a   :  { %2913 = vsyncadd [#allocation13], 4294966784  ;;  %v130_v0 = vlaneseq  ;;  %v2925_v1 = vmov 1983009808   ;;  %v2926_v3 = vmov 0.0|0.0   ;;  %vm2927_vm0 = vmmov 0  }
  0x5b   :  { %v128_v2 = vunpack.c.l.s4 %v2925_v1  ;;  %2604 = vmatprep.subr.bf16.mxu1 %v2926_v3  ;;  %v2928_v4 = vmov 0.0   ;;  %v106_v7 = vld [vmem:[#allocation9] sm:$0xff]  ;;  %v107_v8 = vld [vmem:[#allocation9 + $0x8] sm:$0xff]  ;;  %v108_v9 = vld [vmem:[#allocation9 + $0x10] sm:$0xff]  ;;  %vm159_vm1 = vcmask 261120   ;;  %vm283_vm2 = vcmask 517120  }
  0x5c   :  { %2474 = vmatprep.mubr.msk.f32.mxu1 %vm2927_vm0, %v2928_v4  ;;  %v131_v6 = vshrl.u32 %v130_v0, 7  ;;  %v2596_v11 = vpack.c.bf16 %v107_v8, %v106_v7  ;;  %v109_v12 = vld [vmem:[#allocation9 + $0x18] sm:$0xff]  ;;  %v98_v13 = vld [vmem:[#allocation6] sm:$0x3]  ;;  %v99_v14 = vld [vmem:[#allocation6 + $0x2] sm:$0x3] }
  0x5d   :  { %v129_v5 = vunpack.c.0.s8 %v128_v2  ;;  %v2600_v15 = vpack.c.bf16 %v109_v12, %v108_v9  ;;  %v100_v16 = vld [vmem:[#allocation6 + $0x4] sm:$0x3]  ;;  %v101_v17 = vld [vmem:[#allocation6 + $0x6] sm:$0x3]  ;;  %v125_v18 = vcombine.low %v98_v13, %v99_v14  ;;  %v102_v19 = vld [vmem:[#allocation6 + $0x8] sm:$0x3] }
  0x5e   :  { %2597 = vmatprep.subr.bf16.mxu0 %v2596_v11  ;;  %v126_v20 = vcombine.low %v100_v16, %v101_v17  ;;  %v103_v21 = vld [vmem:[#allocation6 + $0xa] sm:$0x3]  ;;  %v104_v22 = vld [vmem:[#allocation6 + $0xc] sm:$0x3]  ;;  %v105_v23 = vld [vmem:[#allocation6 + $0xe] sm:$0x3] }
  0x5f   :  { %v3057_v10 = vsub.s32 %v129_v5, %v131_v6  ;;  %2599 = vmatpush3.bf16.msra.mxu0 %v2596_v11  ;;  %v142_v25 = vcombine.low %v102_v19, %v103_v21  ;;  %v143_v26 = vcombine.low %v104_v22, %v105_v23  ;;  %v380_v27 = vld [vmem:[#allocation11] sm:$0xff]  ;;  %v381_v28 = vld [vmem:[#allocation11 + $0x8] sm:$0xff]  ;;  %v382_v29 = vld [vmem:[#allocation12] sm:$0xff]  ;;  %s2930_s16 = smov 96   ;;  %s2931_s26 = smov 16   ;;  %vm581_vm3 = vcmask 123904  }
  0x60   :  { %2601 = vmatprep.subr.bf16.mxu0 %v2600_v15  ;;  %v3061_v31 = vpack.c.bf16 %v381_v28, %v380_v27  ;;  %v383_v32 = vld [vmem:[#allocation12 + $0x8] sm:$0xff]  ;;  %v2371_v38 = vld [vmem:[%s3351_s4] ss:$0 sm:$0xff]  ;;  %s2929_s4 = smov 64   ;;  %s2932_s27 = smov 80   ;;  %vm385_vm4 = vcmask 130048  }
  0x61   :  { %v133_v24 = vrot.slane %v125_v18, %v3057_v10  ;;  %v140_v30 = vrot.slane %v126_v20, %v3057_v10  ;;  %v150_v33 = vrot.slane %v142_v25, %v3057_v10  ;;  %v157_v34 = vrot.slane %v143_v26, %v3057_v10  ;;  %s2933_s10 = smov [#allocation15]  }
  0x62   :  { %2606 = vmatpush3.bf16.msra.mxu1 %v3061_v31  ;;  %v3066_v36 = vpack.c.bf16 %v383_v32, %v382_v29  ;;  %s2357_s11 = sshll.u32 %s2933_s10, 4  ;;  %s2358_s11 = int_to_ptr.vmem [resolvable:$true] %s2357_s11 }
  0x63   :  { %v141_v35 = vcombine.low %v133_v24, %v140_v30  ;;  %2603 = vmatpush3.bf16.msra.mxu0 %v2600_v15  ;;  %v158_v37 = vcombine.low %v150_v33, %v157_v34  ;;  %2607 = vmatprep.subr.bf16.mxu1 %v2926_v3  ;;  %p2891_p13 = scmp.lt.s32.totalorder %s2358_s11, %s2358_s11 }
  0x64   :  { %2616 = vmatprep.subr.bf16.mxu0 %v2926_v3 }
  0x65   :  { %2467 = vmatprep.mubr.msk.f32.mxu0 %vm159_vm1, %v141_v35  ;;  %2475 = vmatmul.mubr.f32.vlgmr.msra.gmra.mrb[0].mxu1 %v2928_v4 }
  0x66   :  { %2468 = vmatmul.mubr.msk.f32.vlgmr.msra.gmra.mrb[0].mxu0 %vm159_vm1, %v158_v37  ;;  %2609 = vmatpush3.bf16.msra.mxu1 %v3066_v36 }
  0x67   :  { %2481 = vmatprep.mubr.msk.f32.mxu1 %vm2927_vm0, %v2928_v4  ;;  %2610 = vmatprep.subr.bf16.mxu1 %v2926_v3 }
  0x68   :  { %2618 = vmatpush3.bf16.msra.mxu0 %v3061_v31  ;;  %2502 = vmatprep.mubr.msk.f32.mxu0 %vm2927_vm0, %v2928_v4 }
  0x69   :  { %2482 = vmatmul.mubr.f32.vlgmr.msra.gmra.mrb[2].mxu1 %v2928_v4  ;;  %2622 = vmatprep.subr.bf16.mxu0 %v2926_v3 }
  0x6a   :  { %2612 = vmatpush3.bf16.msra.mxu1 %v3061_v31  ;;  %2488 = vmatprep.mubr.msk.f32.mxu1 %vm2927_vm0, %v2928_v4 }
  0x6b   :  { %2613 = vmatprep.subr.bf16.mxu1 %v2926_v3 }
 0x138   :  { %v455_v39 = vpop.f32.mrb[0].mxu1 }
 0x139   :  { %v2469_v40 = vpop.f32.mrb[0].mxu0  ;;  %v2476_v41 = vpop.f32.mrb[1].mxu1 }
 0x13a   :  { %v236_v42 = vadd.f32 %v2469_v40, %v2371_v38  ;;  %v230_v43 = vpop.f32.mrb[1].mxu0 }
 0x13b   :  { %v231_v44 = vadd.f32 %v2371_v38, %v230_v43 }
 0x13c   :  { %v258_v45 = vcombine.high %v236_v42, %v236_v42  ;;  %v3088_v46 = vrot.slane %v236_v42, %v3057_v10  ;;  %v528_v49 = vpop.f32.mrb[2].mxu1 }
 0x13d   :  { %v241_v47 = vcombine.high %v231_v44, %v231_v44  ;;  %v3091_v48 = vrot.slane %v231_v44, %v3057_v10  ;;  %v2483_v51 = vpop.f32.mrb[3].mxu1 }
 0x13e   :  { %v3094_v50 = vrot.slane %v258_v45, %v3057_v10  ;;  %288 = vst.msk [vmem:[#allocation2 + $0x8] sm:$0x3] %vm283_vm2, %v3088_v46  ;;  %v3100_v52 = vcombine.high %v3088_v46, %v3088_v46 }
 0x13f   :  { %v3103_v53 = vrot.slane %v241_v47, %v3057_v10  ;;  %v3107_v54 = vcombine.high %v3091_v48, %v3091_v48  ;;  %284 = vst.msk [vmem:[#allocation2] sm:$0x3] %vm283_vm2, %v3091_v48 }
 0x140   :  { %290 = vst.msk [vmem:[#allocation2 + $0xc] sm:$0x3] %vm283_vm2, %v3094_v50  ;;  %v274_v55 = vcombine.high %v3094_v50, %v3094_v50  ;;  %289 = vst.msk [vmem:[#allocation2 + $0xa] sm:$0x3] %vm283_vm2, %v3100_v52  ;;  %v340_v26 = vrot.slane %v3094_v50, %v3057_v10 }
 0x141   :  { %v3119_v56 = vcombine.high %v3103_v53, %v3103_v53  ;;  %285 = vst.msk [vmem:[#allocation2 + $0x2] sm:$0x3] %vm283_vm2, %v3107_v54  ;;  %286 = vst.msk [vmem:[#allocation2 + $0x4] sm:$0x3] %vm283_vm2, %v3103_v53 }
 0x142   :  { %v347_v57 = vrot.slane %v274_v55, %v3057_v10  ;;  %291 = vst.msk [vmem:[#allocation2 + $0xe] sm:$0x3] %vm283_vm2, %v274_v55 }
 0x143   :  { %287 = vst.msk [vmem:[#allocation2 + $0x6] sm:$0x3] %vm283_vm2, %v3119_v56 }
 0x144   :  { %362 = vrot.lane.b32.xlu0 %v347_v57, %s2929_s4 }
 0x146   :  { %v384_v58 = vld [vmem:[#allocation2] sm:$0x3] }
 0x147   :  { %v459_v59 = vadd.f32 %v455_v39, %v384_v58 }
 0x148   :  { %v590_v33 = vld [vmem:[#allocation2 + $0x2] sm:$0x3] }
 0x149   :  { %2680 = vtanh.f32 %v459_v59  ;;  %v533_v62 = vmul.f32 0.5, %v459_v59 }
 0x14b   :  { %2682 = vtanh.f32 %v533_v62 }
 0x153   :  { %v2681_v60 = vpop.eup %2680 }
 0x154   :  { %540 = vrot.lane.b32.xlu0 %v2681_v60, %s2930_s16 }
 0x155   :  { %v2683_v1 = vpop.eup %2682 }
 0x156   :  { %v535_v2 = vmul.f32 0.5, %v2683_v1 }
 0x158   :  { %v536_v7 = vadd.f32 0.5, %v535_v2 }
 0x15a   :  { %v538_v16 = vmul.f32 0.0, %v536_v7 }
 0x1b6   :  { %v363_v61 = vpop.permute.xlu0 %362 }
 0x1b7   :  { %379 = vst.msk [vmem:[#allocation3 + $0xe] sm:$0x3] %vm283_vm2, %v363_v61 }
 0x1be   :  { %v461_v63 = vld [vmem:[#allocation3 + $0xe] sm:$0x3] }
 0x1bf   :  { %v532_v0 = vadd.f32 %v528_v49, %v461_v63 }
 0x1c1   :  { %2684 = vtanh.f32 %v532_v0  ;;  %v555_v9 = vmul.f32 0.5, %v532_v0 }
 0x1c3   :  { %2686 = vtanh.f32 %v555_v9 }
 0x1c6   :  { %v541_v6 = vpop.permute.xlu0 %540 }
 0x1c7   :  { %v543_v8 = vmul.f32 %v541_v6, %v536_v7 }
 0x1cb   :  { %v2685_v5 = vpop.eup %2684 }
 0x1cc   :  { %562 = vrot.lane.b32.xlu1 %v2685_v5, %s2930_s16 }
 0x1cd   :  { %v2687_v11 = vpop.eup %2686 }
 0x1ce   :  { %v557_v12 = vmul.f32 0.5, %v2687_v11 }
 0x1d0   :  { %545 = vrot.lane.b32.xlu1 %v543_v8, %s2931_s26  ;;  %v558_v13 = vadd.f32 0.5, %v557_v12 }
 0x1d2   :  { %v560_v20 = vmul.f32 0.0, %v558_v13 }
 0x23e   :  { %v563_v14 = vpop.permute.xlu1 %562 }
 0x23f   :  { %v565_v15 = vmul.f32 %v563_v14, %v558_v13  ;;  %v333_v14 = vrot.slane %v3100_v52, %v3057_v10 }
 0x241   :  { %567 = vrot.lane.b32.xlu0 %v565_v15, %s2931_s26 }
 0x242   :  { %v546_v17 = vpop.permute.xlu1 %545 }
 0x243   :  { %v3135_v18 = vadd.f32 %v546_v17, %v538_v16  ;;  %v796_v16 = vld [vmem:[#allocation2 + $0x4] sm:$0x3] }
 0x245   :  { %2688 = vtanh.f32 %v3135_v18 }
 0x24f   :  { %v2689_v19 = vpop.eup %2688 }
 0x250   :  { %551 = vrot.lane.b32.xlu1 %v2689_v19, %s2921_s3 }
 0x2b3   :  { %v568_v21 = vpop.permute.xlu0 %567 }
 0x2b4   :  { %v3139_v22 = vadd.f32 %v568_v21, %v560_v20 }
 0x2b6   :  { %2690 = vtanh.f32 %v3139_v22 }
 0x2c0   :  { %v2691_v23 = vpop.eup %2690 }
 0x2c1   :  { %573 = vrot.lane.b32.xlu0 %v2691_v23, %s2921_s3 }
 0x2c2   :  { %v552_v24 = vpop.permute.xlu1 %551 }
 0x2c3   :  { %v554_v25 = vmul.f32 %v552_v24, %v536_v7 }
 0x2c5   :  { %578 = vrot.lane.b32.xlu1 %v554_v25, %s2932_s27 }
 0x2c9   :  { %360 = vrot.lane.b32.xlu1 %v340_v26, %s2929_s4 }
 0x333   :  { %v574_v27 = vpop.permute.xlu0 %573 }
 0x334   :  { %v576_v28 = vmul.f32 %v574_v27, %v558_v13 }
 0x336   :  { %584 = vrot.lane.b32.xlu0 %v576_v28, %s2932_s27 }
 0x337   :  { %v579_v29 = vpop.permute.xlu1 %578 }
 0x338   :  { %582 = vst.msk [vmem:[#allocation4] sm:$0x3] %vm581_vm3, %v579_v29  ;;  %2489 = vmatmul.mubr.msk.f32.vlgmr.msra.gmra.mrb[4].mxu1 %vm385_vm4, %v579_v29 }
 0x339   :  { %2615 = vmatpush3.bf16.msra.mxu1 %v3066_v36  ;;  %2495 = vmatprep.mubr.msk.f32.mxu1 %vm2927_vm0, %v2928_v4 }
 0x33a   :  { %2619 = vmatprep.subr.bf16.mxu1 %v2926_v3 }
 0x33b   :  { %v361_v30 = vpop.permute.xlu1 %360 }
 0x33c   :  { %378 = vst.msk [vmem:[#allocation3 + $0xc] sm:$0x3] %vm283_vm2, %v361_v30 }
 0x343   :  { %v665_v40 = vld [vmem:[#allocation3 + $0xc] sm:$0x3] }
 0x3a8   :  { %v585_v32 = vpop.permute.xlu0 %584 }
 0x3a9   :  { %588 = vst.msk [vmem:[#allocation5 + $0xe] sm:$0x3] %vm581_vm3, %v585_v32  ;;  %2496 = vmatmul.mubr.msk.f32.vlgmr.msra.gmra.mrb[6].mxu1 %vm385_vm4, %v585_v32 }
 0x3aa   :  { %2621 = vmatpush3.bf16.msra.mxu1 %v3066_v36  ;;  %2509 = vmatprep.mubr.msk.f32.mxu1 %vm2927_vm0, %v2928_v4 }
 0x3ab   :  { %2625 = vmatprep.subr.bf16.mxu1 %v2926_v3 }
 0x40b   :  { %v659_v34 = vpop.f32.mrb[4].mxu1 }
 0x40c   :  { %v663_v35 = vadd.f32 %v659_v34, %v590_v33  ;;  %v2490_v37 = vpop.f32.mrb[5].mxu1 }
 0x40e   :  { %2692 = vtanh.f32 %v663_v35  ;;  %v739_v39 = vmul.f32 0.5, %v663_v35 }
 0x410   :  { %2694 = vtanh.f32 %v739_v39 }
 0x418   :  { %v2693_v38 = vpop.eup %2692 }
 0x419   :  { %746 = vrot.lane.b32.xlu1 %v2693_v38, %s2930_s16 }
 0x41a   :  { %v2695_v44 = vpop.eup %2694 }
 0x41b   :  { %v741_v45 = vmul.f32 0.5, %v2695_v44 }
 0x41d   :  { %v742_v49 = vadd.f32 0.5, %v741_v45 }
 0x41f   :  { %v744_v62 = vmul.f32 %v742_v49, %v3135_v18 }
 0x47c   :  { %v734_v41 = vpop.f32.mrb[6].mxu1 }
 0x47d   :  { %v738_v42 = vadd.f32 %v734_v41, %v665_v40  ;;  %v2497_v43 = vpop.f32.mrb[7].mxu1 }
 0x47f   :  { %2696 = vtanh.f32 %v738_v42  ;;  %v761_v55 = vmul.f32 0.5, %v738_v42 }
 0x481   :  { %2698 = vtanh.f32 %v761_v55 }
 0x489   :  { %v2697_v47 = vpop.eup %2696 }
 0x48a   :  { %768 = vrot.lane.b32.xlu0 %v2697_v47, %s2930_s16 }
 0x48b   :  { %v747_v50 = vpop.permute.xlu1 %746  ;;  %v2699_v57 = vpop.eup %2698 }
 0x48c   :  { %v749_v51 = vmul.f32 %v747_v50, %v742_v49  ;;  %v763_v58 = vmul.f32 0.5, %v2699_v57 }
 0x48e   :  { %751 = vrot.lane.b32.xlu1 %v749_v51, %s2931_s26  ;;  %v764_v59 = vadd.f32 0.5, %v763_v58 }
 0x490   :  { %v766_v2 = vmul.f32 %v764_v59, %v3139_v22 }
 0x4fc   :  { %v769_v60 = vpop.permute.xlu0 %768 }
 0x4fd   :  { %v771_v61 = vmul.f32 %v769_v60, %v764_v59 }
 0x4ff   :  { %773 = vrot.lane.b32.xlu0 %v771_v61, %s2931_s26  ;;  %v1002_v61 = vld [vmem:[#allocation2 + $0x6] sm:$0x3] }
 0x500   :  { %v752_v63 = vpop.permute.xlu1 %751 }
 0x501   :  { %v754_v0 = vadd.f32 %v752_v63, %v744_v62 }
 0x503   :  { %2700 = vtanh.f32 %v754_v0 }
 0x50d   :  { %v2701_v1 = vpop.eup %2700 }
 0x50e   :  { %757 = vrot.lane.b32.xlu1 %v2701_v1, %s2921_s3 }
 0x571   :  { %v774_v5 = vpop.permute.xlu0 %773 }
 0x572   :  { %v776_v6 = vadd.f32 %v774_v5, %v766_v2 }
 0x574   :  { %2702 = vtanh.f32 %v776_v6 }
 0x57e   :  { %v2703_v7 = vpop.eup %2702 }
 0x57f   :  { %779 = vrot.lane.b32.xlu0 %v2703_v7, %s2921_s3 }
 0x580   :  { %v758_v8 = vpop.permute.xlu1 %757 }
 0x581   :  { %v760_v9 = vmul.f32 %v758_v8, %v742_v49 }
 0x583   :  { %784 = vrot.lane.b32.xlu1 %v760_v9, %s2932_s27 }
 0x5f1   :  { %v780_v11 = vpop.permute.xlu0 %779 }
 0x5f2   :  { %v782_v12 = vmul.f32 %v780_v11, %v764_v59  ;;  %v326_v59 = vrot.slane %v3088_v46, %v3057_v10 }
 0x5f4   :  { %790 = vrot.lane.b32.xlu0 %v782_v12, %s2932_s27 }
 0x5f5   :  { %v785_v13 = vpop.permute.xlu1 %784 }
 0x5f6   :  { %788 = vst.msk [vmem:[#allocation4 + $0x2] sm:$0x3] %vm581_vm3, %v785_v13  ;;  %2503 = vmatmul.mubr.msk.f32.vlgmr.msra.gmra.mrb[2].mxu0 %vm385_vm4, %v785_v13 }
 0x5f7   :  { %2624 = vmatpush3.bf16.msra.mxu0 %v3061_v31  ;;  %2516 = vmatprep.mubr.msk.f32.mxu0 %vm2927_vm0, %v2928_v4 }
 0x5f8   :  { %358 = vrot.lane.b32.xlu0 %v333_v14, %s2929_s4  ;;  %2628 = vmatprep.subr.bf16.mxu0 %v2926_v3 }
 0x666   :  { %v791_v15 = vpop.permute.xlu0 %790 }
 0x667   :  { %794 = vst.msk [vmem:[#allocation5 + $0xc] sm:$0x3] %vm581_vm3, %v791_v15  ;;  %2510 = vmatmul.mubr.msk.f32.vlgmr.msra.gmra.mrb[8].mxu1 %vm385_vm4, %v791_v15 }
 0x668   :  { %2627 = vmatpush3.bf16.msra.mxu1 %v3066_v36  ;;  %2523 = vmatprep.mubr.msk.f32.mxu1 %vm2927_vm0, %v2928_v4 }
 0x669   :  { %2631 = vmatprep.subr.bf16.mxu1 %v2926_v3 }
 0x66a   :  { %v359_v52 = vpop.permute.xlu0 %358 }
 0x66b   :  { %377 = vst.msk [vmem:[#allocation3 + $0xa] sm:$0x3] %vm283_vm2, %v359_v52 }
 0x672   :  { %v871_v22 = vld [vmem:[#allocation3 + $0xa] sm:$0x3] }
 0x6c9   :  { %v865_v17 = vpop.f32.mrb[2].mxu0 }
 0x6ca   :  { %v869_v18 = vadd.f32 %v865_v17, %v796_v16  ;;  %v2504_v19 = vpop.f32.mrb[3].mxu0 }
 0x6cc   :  { %2704 = vtanh.f32 %v869_v18  ;;  %v945_v21 = vmul.f32 0.5, %v869_v18 }
 0x6ce   :  { %2706 = vtanh.f32 %v945_v21 }
 0x6d6   :  { %v2705_v20 = vpop.eup %2704 }
 0x6d7   :  { %952 = vrot.lane.b32.xlu0 %v2705_v20, %s2930_s16 }
 0x6d8   :  { %v2707_v26 = vpop.eup %2706 }
 0x6d9   :  { %v947_v27 = vmul.f32 0.5, %v2707_v26 }
 0x6db   :  { %v948_v29 = vadd.f32 0.5, %v947_v27 }
 0x6dd   :  { %v950_v40 = vmul.f32 %v948_v29, %v754_v0 }
 0x73a   :  { %v940_v23 = vpop.f32.mrb[8].mxu1 }
 0x73b   :  { %v944_v24 = vadd.f32 %v940_v23, %v871_v22  ;;  %v2511_v25 = vpop.f32.mrb[9].mxu1 }
 0x73d   :  { %2708 = vtanh.f32 %v944_v24  ;;  %v967_v33 = vmul.f32 0.5, %v944_v24 }
 0x73f   :  { %2710 = vtanh.f32 %v967_v33 }
 0x747   :  { %v2709_v28 = vpop.eup %2708 }
 0x748   :  { %974 = vrot.lane.b32.xlu1 %v2709_v28, %s2930_s16 }
 0x749   :  { %v953_v30 = vpop.permute.xlu0 %952  ;;  %v2711_v34 = vpop.eup %2710 }
 0x74a   :  { %v955_v32 = vmul.f32 %v953_v30, %v948_v29  ;;  %v969_v35 = vmul.f32 0.5, %v2711_v34 }
 0x74c   :  { %957 = vrot.lane.b32.xlu0 %v955_v32, %s2931_s26  ;;  %v970_v37 = vadd.f32 0.5, %v969_v35  ;;  %v319_v35 = vrot.slane %v3119_v56, %v3057_v10 }
 0x74e   :  { %v972_v44 = vmul.f32 %v970_v37, %v776_v6 }
 0x7ba   :  { %v975_v38 = vpop.permute.xlu1 %974 }
 0x7bb   :  { %v977_v39 = vmul.f32 %v975_v38, %v970_v37  ;;  %v1208_v38 = vld [vmem:[#allocation2 + $0x8] sm:$0x3] }
 0x7bd   :  { %979 = vrot.lane.b32.xlu1 %v977_v39, %s2931_s26 }
 0x7be   :  { %v958_v41 = vpop.permute.xlu0 %957 }
 0x7bf   :  { %v960_v42 = vadd.f32 %v958_v41, %v950_v40 }
 0x7c1   :  { %2712 = vtanh.f32 %v960_v42 }
 0x7cb   :  { %v2713_v43 = vpop.eup %2712 }
 0x7cc   :  { %963 = vrot.lane.b32.xlu0 %v2713_v43, %s2921_s3 }
 0x82f   :  { %v980_v45 = vpop.permute.xlu1 %979 }
 0x830   :  { %v982_v47 = vadd.f32 %v980_v45, %v972_v44 }
 0x832   :  { %2714 = vtanh.f32 %v982_v47 }
 0x83c   :  { %v2715_v49 = vpop.eup %2714 }
 0x83d   :  { %985 = vrot.lane.b32.xlu1 %v2715_v49, %s2921_s3 }
 0x83e   :  { %v964_v50 = vpop.permute.xlu0 %963 }
 0x83f   :  { %v966_v51 = vmul.f32 %v964_v50, %v948_v29 }
 0x841   :  { %990 = vrot.lane.b32.xlu0 %v966_v51, %s2932_s27 }
 0x8af   :  { %v986_v55 = vpop.permute.xlu1 %985 }
 0x8b0   :  { %v988_v57 = vmul.f32 %v986_v55, %v970_v37 }
 0x8b2   :  { %996 = vrot.lane.b32.xlu1 %v988_v57, %s2932_s27 }
 0x8b3   :  { %v991_v58 = vpop.permute.xlu0 %990 }
 0x8b4   :  { %994 = vst.msk [vmem:[#allocation4 + $0x4] sm:$0x3] %vm581_vm3, %v991_v58  ;;  %2517 = vmatmul.mubr.msk.f32.vlgmr.msra.gmra.mrb[4].mxu0 %vm385_vm4, %v991_v58 }
 0x8b5   :  { %2630 = vmatpush3.bf16.msra.mxu0 %v3061_v31  ;;  %2530 = vmatprep.mubr.msk.f32.mxu0 %vm2927_vm0, %v2928_v4 }
 0x8b6   :  { %356 = vrot.lane.b32.xlu1 %v326_v59, %s2929_s4  ;;  %2634 = vmatprep.subr.bf16.mxu0 %v2926_v3 }
 0x924   :  { %v997_v60 = vpop.permute.xlu1 %996 }
 0x925   :  { %1000 = vst.msk [vmem:[#allocation5 + $0xa] sm:$0x3] %vm581_vm3, %v997_v60  ;;  %2524 = vmatmul.mubr.msk.f32.vlgmr.msra.gmra.mrb[10].mxu1 %vm385_vm4, %v997_v60 }
 0x926   :  { %2633 = vmatpush3.bf16.msra.mxu1 %v3066_v36  ;;  %2537 = vmatprep.mubr.msk.f32.mxu1 %vm2927_vm0, %v2928_v4 }
 0x927   :  { %2637 = vmatprep.subr.bf16.mxu1 %v2926_v3 }
 0x928   :  { %v357_v46 = vpop.permute.xlu1 %356 }
 0x929   :  { %376 = vst.msk [vmem:[#allocation3 + $0x8] sm:$0x3] %vm283_vm2, %v357_v46 }
 0x930   :  { %v1077_v5 = vld [vmem:[#allocation3 + $0x8] sm:$0x3] }
 0x987   :  { %v1071_v62 = vpop.f32.mrb[4].mxu0 }
 0x988   :  { %v1075_v63 = vadd.f32 %v1071_v62, %v1002_v61  ;;  %v2518_v0 = vpop.f32.mrb[5].mxu0 }
 0x98a   :  { %2716 = vtanh.f32 %v1075_v63  ;;  %v1151_v2 = vmul.f32 0.5, %v1075_v63 }
 0x98c   :  { %2718 = vtanh.f32 %v1151_v2 }
 0x994   :  { %v2717_v1 = vpop.eup %2716 }
 0x995   :  { %1158 = vrot.lane.b32.xlu1 %v2717_v1, %s2930_s16 }
 0x996   :  { %v2719_v9 = vpop.eup %2718 }
 0x997   :  { %v1153_v11 = vmul.f32 0.5, %v2719_v9 }
 0x999   :  { %v1154_v13 = vadd.f32 0.5, %v1153_v11 }
 0x99b   :  { %v1156_v21 = vmul.f32 %v1154_v13, %v960_v42 }
 0x9f8   :  { %v1146_v6 = vpop.f32.mrb[10].mxu1 }
 0x9f9   :  { %v1150_v7 = vadd.f32 %v1146_v6, %v1077_v5  ;;  %v2525_v8 = vpop.f32.mrb[11].mxu1 }
 0x9fb   :  { %2720 = vtanh.f32 %v1150_v7  ;;  %v1173_v52 = vmul.f32 0.5, %v1150_v7 }
 0x9fd   :  { %2722 = vtanh.f32 %v1173_v52 }
 0xa05   :  { %v2721_v12 = vpop.eup %2720 }
 0xa06   :  { %1180 = vrot.lane.b32.xlu0 %v2721_v12, %s2930_s16 }
 0xa07   :  { %v1159_v14 = vpop.permute.xlu1 %1158  ;;  %v2723_v16 = vpop.eup %2722 }
 0xa08   :  { %v1161_v15 = vmul.f32 %v1159_v14, %v1154_v13  ;;  %v1175_v17 = vmul.f32 0.5, %v2723_v16  ;;  %v312_v16 = vrot.slane %v3103_v53, %v3057_v10 }
 0xa0a   :  { %1163 = vrot.lane.b32.xlu1 %v1161_v15, %s2931_s26  ;;  %v1176_v18 = vadd.f32 0.5, %v1175_v17 }
 0xa0c   :  { %v1178_v25 = vmul.f32 %v1176_v18, %v982_v47 }
 0xa78   :  { %v1181_v19 = vpop.permute.xlu0 %1180 }
 0xa79   :  { %v1183_v20 = vmul.f32 %v1181_v19, %v1176_v18 }
 0xa7b   :  { %1185 = vrot.lane.b32.xlu0 %v1183_v20, %s2931_s26 }
 0xa7c   :  { %v1164_v22 = vpop.permute.xlu1 %1163 }
 0xa7d   :  { %v1166_v23 = vadd.f32 %v1164_v22, %v1156_v21 }
 0xa7f   :  { %2724 = vtanh.f32 %v1166_v23 }
 0xa89   :  { %v2725_v24 = vpop.eup %2724 }
 0xa8a   :  { %1169 = vrot.lane.b32.xlu1 %v2725_v24, %s2921_s3 }
 0xaed   :  { %v1186_v26 = vpop.permute.xlu0 %1185 }
 0xaee   :  { %v1188_v27 = vadd.f32 %v1186_v26, %v1178_v25 }
 0xaf0   :  { %2726 = vtanh.f32 %v1188_v27 }
 0xafa   :  { %v2727_v28 = vpop.eup %2726 }
 0xafb   :  { %1191 = vrot.lane.b32.xlu0 %v2727_v28, %s2921_s3 }
 0xafc   :  { %v1170_v29 = vpop.permute.xlu1 %1169 }
 0xafd   :  { %v1172_v30 = vmul.f32 %v1170_v29, %v1154_v13 }
 0xaff   :  { %1196 = vrot.lane.b32.xlu1 %v1172_v30, %s2932_s27 }
 0xb6d   :  { %v1192_v32 = vpop.permute.xlu0 %1191 }
 0xb6e   :  { %v1194_v33 = vmul.f32 %v1192_v32, %v1176_v18  ;;  %v1414_v18 = vld [vmem:[#allocation2 + $0xa] sm:$0x3] }
 0xb70   :  { %1202 = vrot.lane.b32.xlu0 %v1194_v33, %s2932_s27 }
 0xb71   :  { %v1197_v34 = vpop.permute.xlu1 %1196 }
 0xb72   :  { %1200 = vst.msk [vmem:[#allocation4 + $0x6] sm:$0x3] %vm581_vm3, %v1197_v34  ;;  %2531 = vmatmul.mubr.msk.f32.vlgmr.msra.gmra.mrb[6].mxu0 %vm385_vm4, %v1197_v34 }
 0xb73   :  { %2636 = vmatpush3.bf16.msra.mxu0 %v3061_v31  ;;  %2544 = vmatprep.mubr.msk.f32.mxu0 %vm2927_vm0, %v2928_v4 }
 0xb74   :  { %354 = vrot.lane.b32.xlu0 %v319_v35, %s2929_s4  ;;  %2640 = vmatprep.subr.bf16.mxu0 %v2926_v3 }
 0xbe2   :  { %v1203_v37 = vpop.permute.xlu0 %1202 }
 0xbe3   :  { %1206 = vst.msk [vmem:[#allocation5 + $0x8] sm:$0x3] %vm581_vm3, %v1203_v37  ;;  %2538 = vmatmul.mubr.msk.f32.vlgmr.msra.gmra.mrb[12].mxu1 %vm385_vm4, %v1203_v37 }
 0xbe4   :  { %2639 = vmatpush3.bf16.msra.mxu1 %v3066_v36  ;;  %2551 = vmatprep.mubr.msk.f32.mxu1 %vm2927_vm0, %v2928_v4 }
 0xbe5   :  { %2643 = vmatprep.subr.bf16.mxu1 %v2926_v3 }
 0xbe6   :  { %v355_v56 = vpop.permute.xlu0 %354 }
 0xbe7   :  { %375 = vst.msk [vmem:[#allocation3 + $0x6] sm:$0x3] %vm283_vm2, %v355_v56 }
 0xbee   :  { %v1283_v44 = vld [vmem:[#allocation3 + $0x6] sm:$0x3] }
 0xc45   :  { %v1277_v39 = vpop.f32.mrb[6].mxu0 }
 0xc46   :  { %v1281_v40 = vadd.f32 %v1277_v39, %v1208_v38  ;;  %v2532_v41 = vpop.f32.mrb[7].mxu0 }
 0xc48   :  { %2728 = vtanh.f32 %v1281_v40  ;;  %v1357_v43 = vmul.f32 0.5, %v1281_v40 }
 0xc4a   :  { %2730 = vtanh.f32 %v1357_v43 }
 0xc52   :  { %v2729_v42 = vpop.eup %2728 }
 0xc53   :  { %1364 = vrot.lane.b32.xlu0 %v2729_v42, %s2930_s16 }
 0xc54   :  { %v2731_v50 = vpop.eup %2730 }
 0xc55   :  { %v1359_v51 = vmul.f32 0.5, %v2731_v50 }
 0xc57   :  { %v1360_v57 = vadd.f32 0.5, %v1359_v51 }
 0xc59   :  { %v1362_v1 = vmul.f32 %v1360_v57, %v1166_v23 }
 0xcb6   :  { %v1352_v45 = vpop.f32.mrb[12].mxu1 }
 0xcb7   :  { %v1356_v47 = vadd.f32 %v1352_v45, %v1283_v44  ;;  %v2539_v49 = vpop.f32.mrb[13].mxu1 }
 0xcb9   :  { %2732 = vtanh.f32 %v1356_v47  ;;  %v1379_v60 = vmul.f32 0.5, %v1356_v47 }
 0xcbb   :  { %2734 = vtanh.f32 %v1379_v60 }
 0xcc3   :  { %v2733_v55 = vpop.eup %2732 }
 0xcc4   :  { %1386 = vrot.lane.b32.xlu1 %v2733_v55, %s2930_s16 }
 0xcc5   :  { %v1365_v58 = vpop.permute.xlu0 %1364  ;;  %v2735_v46 = vpop.eup %2734 }
 0xcc6   :  { %v1367_v59 = vmul.f32 %v1365_v58, %v1360_v57  ;;  %v1381_v61 = vmul.f32 0.5, %v2735_v46 }
 0xcc8   :  { %1369 = vrot.lane.b32.xlu0 %v1367_v59, %s2931_s26  ;;  %v1382_v62 = vadd.f32 0.5, %v1381_v61  ;;  %v305_v59 = vrot.slane %v3107_v54, %v3057_v10  ;;  %v1620_v54 = vld [vmem:[#allocation2 + $0xc] sm:$0x3] }
 0xcca   :  { %v1384_v7 = vmul.f32 %v1382_v62, %v1188_v27 }
 0xd36   :  { %v1387_v63 = vpop.permute.xlu1 %1386 }
 0xd37   :  { %v1389_v0 = vmul.f32 %v1387_v63, %v1382_v62 }
 0xd39   :  { %1391 = vrot.lane.b32.xlu1 %v1389_v0, %s2931_s26 }
 0xd3a   :  { %v1370_v2 = vpop.permute.xlu0 %1369 }
 0xd3b   :  { %v1372_v5 = vadd.f32 %v1370_v2, %v1362_v1 }
 0xd3d   :  { %2736 = vtanh.f32 %v1372_v5 }
 0xd47   :  { %v2737_v6 = vpop.eup %2736 }
 0xd48   :  { %1375 = vrot.lane.b32.xlu0 %v2737_v6, %s2921_s3 }
 0xdab   :  { %v1392_v8 = vpop.permute.xlu1 %1391 }
 0xdac   :  { %v1394_v9 = vadd.f32 %v1392_v8, %v1384_v7 }
 0xdae   :  { %2738 = vtanh.f32 %v1394_v9 }
 0xdb8   :  { %v2739_v11 = vpop.eup %2738 }
 0xdb9   :  { %1397 = vrot.lane.b32.xlu1 %v2739_v11, %s2921_s3 }
 0xdba   :  { %v1376_v12 = vpop.permute.xlu0 %1375 }
 0xdbb   :  { %v1378_v13 = vmul.f32 %v1376_v12, %v1360_v57 }
 0xdbd   :  { %1402 = vrot.lane.b32.xlu0 %v1378_v13, %s2932_s27 }
 0xe2b   :  { %v1398_v14 = vpop.permute.xlu1 %1397 }
 0xe2c   :  { %v1400_v15 = vmul.f32 %v1398_v14, %v1382_v62 }
 0xe2e   :  { %1408 = vrot.lane.b32.xlu1 %v1400_v15, %s2932_s27 }
 0xe2f   :  { %v1403_v52 = vpop.permute.xlu0 %1402 }
 0xe30   :  { %1406 = vst.msk [vmem:[#allocation4 + $0x8] sm:$0x3] %vm581_vm3, %v1403_v52  ;;  %2545 = vmatmul.mubr.msk.f32.vlgmr.msra.gmra.mrb[8].mxu0 %vm385_vm4, %v1403_v52 }
 0xe31   :  { %2642 = vmatpush3.bf16.msra.mxu0 %v3061_v31  ;;  %2558 = vmatprep.mubr.msk.f32.mxu0 %vm2927_vm0, %v2928_v4 }
 0xe32   :  { %352 = vrot.lane.b32.xlu1 %v312_v16, %s2929_s4  ;;  %2646 = vmatprep.subr.bf16.mxu0 %v2926_v3 }
 0xea0   :  { %v1409_v17 = vpop.permute.xlu1 %1408 }
 0xea1   :  { %1412 = vst.msk [vmem:[#allocation5 + $0x6] sm:$0x3] %vm581_vm3, %v1409_v17  ;;  %2552 = vmatmul.mubr.msk.f32.vlgmr.msra.gmra.mrb[14].mxu1 %vm385_vm4, %v1409_v17 }
 0xea2   :  { %2645 = vmatpush3.bf16.msra.mxu1 %v3066_v36  ;;  %2565 = vmatprep.mubr.msk.f32.mxu1 %vm2927_vm0, %v2928_v4 }
 0xea3   :  { %2649 = vmatprep.subr.bf16.mxu1 %v2926_v3 }
 0xea4   :  { %v353_v53 = vpop.permute.xlu1 %352 }
 0xea5   :  { %374 = vst.msk [vmem:[#allocation3 + $0x4] sm:$0x3] %vm283_vm2, %v353_v53 }
 0xeac   :  { %v1489_v24 = vld [vmem:[#allocation3 + $0x4] sm:$0x3] }
 0xf03   :  { %v1483_v19 = vpop.f32.mrb[8].mxu0 }
 0xf04   :  { %v1487_v20 = vadd.f32 %v1483_v19, %v1414_v18  ;;  %v2546_v21 = vpop.f32.mrb[9].mxu0 }
 0xf06   :  { %2740 = vtanh.f32 %v1487_v20  ;;  %v1563_v23 = vmul.f32 0.5, %v1487_v20 }
 0xf08   :  { %2742 = vtanh.f32 %v1563_v23 }
 0xf10   :  { %v2741_v22 = vpop.eup %2740 }
 0xf11   :  { %1570 = vrot.lane.b32.xlu1 %v2741_v22, %s2930_s16 }
 0xf12   :  { %v2743_v28 = vpop.eup %2742 }
 0xf13   :  { %v1565_v3 = vmul.f32 0.5, %v2743_v28 }
 0xf15   :  { %v1566_v30 = vadd.f32 0.5, %v1565_v3  ;;  %v298_v3 = vrot.slane %v3091_v48, %v3057_v10 }
 0xf17   :  { %v1568_v40 = vmul.f32 %v1566_v30, %v1372_v5 }
 0xf74   :  { %v1558_v25 = vpop.f32.mrb[14].mxu1 }
 0xf75   :  { %v1562_v26 = vadd.f32 %v1558_v25, %v1489_v24  ;;  %v2553_v27 = vpop.f32.mrb[15].mxu1 }
 0xf77   :  { %2744 = vtanh.f32 %v1562_v26  ;;  %v1585_v34 = vmul.f32 0.5, %v1562_v26 }
 0xf79   :  { %2746 = vtanh.f32 %v1585_v34 }
 0xf81   :  { %v2745_v29 = vpop.eup %2744 }
 0xf82   :  { %1592 = vrot.lane.b32.xlu0 %v2745_v29, %s2930_s16 }
 0xf83   :  { %v1571_v32 = vpop.permute.xlu1 %1570  ;;  %v2747_v35 = vpop.eup %2746 }
 0xf84   :  { %v1573_v33 = vmul.f32 %v1571_v32, %v1566_v30  ;;  %v1587_v37 = vmul.f32 0.5, %v2747_v35  ;;  %v1826_v32 = vld [vmem:[#allocation2 + $0xe] sm:$0x3] }
 0xf86   :  { %1575 = vrot.lane.b32.xlu1 %v1573_v33, %s2931_s26  ;;  %v1588_v56 = vadd.f32 0.5, %v1587_v37 }
 0xf88   :  { %v1590_v44 = vmul.f32 %v1588_v56, %v1394_v9 }
 0xff4   :  { %v1593_v38 = vpop.permute.xlu0 %1592 }
 0xff5   :  { %v1595_v39 = vmul.f32 %v1593_v38, %v1588_v56 }
 0xff7   :  { %1597 = vrot.lane.b32.xlu0 %v1595_v39, %s2931_s26 }
 0xff8   :  { %v1576_v41 = vpop.permute.xlu1 %1575 }
 0xff9   :  { %v1578_v42 = vadd.f32 %v1576_v41, %v1568_v40 }
 0xffb   :  { %2748 = vtanh.f32 %v1578_v42 }
0x1005   :  { %v2749_v43 = vpop.eup %2748 }
0x1006   :  { %1581 = vrot.lane.b32.xlu1 %v2749_v43, %s2921_s3 }
0x1069   :  { %v1598_v45 = vpop.permute.xlu0 %1597 }
0x106a   :  { %v1600_v47 = vadd.f32 %v1598_v45, %v1590_v44 }
0x106c   :  { %2750 = vtanh.f32 %v1600_v47 }
0x1076   :  { %v2751_v49 = vpop.eup %2750 }
0x1077   :  { %1603 = vrot.lane.b32.xlu0 %v2751_v49, %s2921_s3 }
0x1078   :  { %v1582_v50 = vpop.permute.xlu1 %1581 }
0x1079   :  { %v1584_v51 = vmul.f32 %v1582_v50, %v1566_v30 }
0x107b   :  { %1608 = vrot.lane.b32.xlu1 %v1584_v51, %s2932_s27 }
0x10e9   :  { %v1604_v55 = vpop.permute.xlu0 %1603 }
0x10ea   :  { %v1606_v57 = vmul.f32 %v1604_v55, %v1588_v56 }
0x10ec   :  { %1614 = vrot.lane.b32.xlu0 %v1606_v57, %s2932_s27 }
0x10ed   :  { %v1609_v58 = vpop.permute.xlu1 %1608 }
0x10ee   :  { %1612 = vst.msk [vmem:[#allocation4 + $0xa] sm:$0x3] %vm581_vm3, %v1609_v58  ;;  %2559 = vmatmul.mubr.msk.f32.vlgmr.msra.gmra.mrb[10].mxu0 %vm385_vm4, %v1609_v58 }
0x10ef   :  { %2648 = vmatpush3.bf16.msra.mxu0 %v3061_v31  ;;  %2572 = vmatprep.mubr.msk.f32.mxu0 %vm2927_vm0, %v2928_v4 }
0x10f0   :  { %350 = vrot.lane.b32.xlu0 %v305_v59, %s2929_s4 }
0x115e   :  { %v1615_v60 = vpop.permute.xlu0 %1614 }
0x115f   :  { %1618 = vst.msk [vmem:[#allocation5 + $0x4] sm:$0x3] %vm581_vm3, %v1615_v60  ;;  %2566 = vmatmul.mubr.msk.f32.vlgmr.msra.gmra.mrb[16].mxu1 %vm385_vm4, %v1615_v60 }
0x1160   :  { %2651 = vmatpush3.bf16.msra.mxu1 %v3066_v36  ;;  %2579 = vmatprep.mubr.msk.f32.mxu1 %vm2927_vm0, %v2928_v4 }
0x1162   :  { %v351_v46 = vpop.permute.xlu0 %350 }
0x1163   :  { %373 = vst.msk [vmem:[#allocation3 + $0x2] sm:$0x3] %vm283_vm2, %v351_v46 }
0x116a   :  { %v1695_v1 = vld [vmem:[#allocation3 + $0x2] sm:$0x3] }
0x11c1   :  { %v1689_v31 = vpop.f32.mrb[10].mxu0 }
0x11c2   :  { %v1693_v61 = vadd.f32 %v1689_v31, %v1620_v54  ;;  %v2560_v62 = vpop.f32.mrb[11].mxu0 }
0x11c4   :  { %2752 = vtanh.f32 %v1693_v61  ;;  %v1769_v0 = vmul.f32 0.5, %v1693_v61 }
0x11c6   :  { %2754 = vtanh.f32 %v1769_v0 }
0x11ce   :  { %v2753_v63 = vpop.eup %2752 }
0x11cf   :  { %1776 = vrot.lane.b32.xlu0 %v2753_v63, %s2930_s16 }
0x11d0   :  { %v2755_v6 = vpop.eup %2754 }
0x11d1   :  { %v1771_v4 = vmul.f32 0.5, %v2755_v6 }
0x11d3   :  { %v1772_v8 = vadd.f32 0.5, %v1771_v4 }
0x11d5   :  { %v1774_v17 = vmul.f32 %v1772_v8, %v1578_v42 }
0x1232   :  { %v1764_v2 = vpop.f32.mrb[16].mxu1 }
0x1233   :  { %v1768_v5 = vadd.f32 %v1764_v2, %v1695_v1  ;;  %v2567_v36 = vpop.f32.mrb[17].mxu1  ;;  %v2047_v2 = vld [vmem:[#allocation14] sm:$0xff] }
0x1235   :  { %2756 = vtanh.f32 %v1768_v5  ;;  %v1791_v12 = vmul.f32 0.5, %v1768_v5  ;;  %v2048_v5 = vld [vmem:[#allocation14 + $0x8] sm:$0xff] }
0x1236   :  { %v2652_v36 = vpack.c.bf16 %v2048_v5, %v2047_v2 }
0x1237   :  { %2758 = vtanh.f32 %v1791_v12 }
0x1238   :  { %2653 = vmatprep.subr.bf16.mxu0 %v2652_v36 }
0x123f   :  { %v2757_v7 = vpop.eup %2756 }
0x1240   :  { %1798 = vrot.lane.b32.xlu1 %v2757_v7, %s2930_s16 }
0x1241   :  { %v1777_v9 = vpop.permute.xlu0 %1776  ;;  %v2759_v13 = vpop.eup %2758 }
0x1242   :  { %v1779_v11 = vmul.f32 %v1777_v9, %v1772_v8  ;;  %v1793_v14 = vmul.f32 0.5, %v2759_v13  ;;  %v2046_v9 = vld [vmem:[%s3352_s5 + $0x8] sm:$0xff]  ;;  %v2041_v13 = vld [vmem:[#allocation5 + $0x8] sm:$0x3] }
0x1244   :  { %1781 = vrot.lane.b32.xlu0 %v1779_v11, %s2931_s26  ;;  %v1794_v15 = vadd.f32 0.5, %v1793_v14  ;;  %v2039_v14 = vld [vmem:[#allocation5 + $0x4] sm:$0x3] }
0x1246   :  { %v1796_v20 = vmul.f32 %v1794_v15, %v1600_v47 }
0x12b2   :  { %v1799_v52 = vpop.permute.xlu1 %1798 }
0x12b3   :  { %v1801_v16 = vmul.f32 %v1799_v52, %v1794_v15  ;;  %v2042_v52 = vld [vmem:[#allocation5 + $0xa] sm:$0x3] }
0x12b5   :  { %1803 = vrot.lane.b32.xlu1 %v1801_v16, %s2931_s26  ;;  %v2043_v16 = vld [vmem:[#allocation5 + $0xc] sm:$0x3] }
0x12b6   :  { %v1782_v53 = vpop.permute.xlu0 %1781 }
0x12b7   :  { %v1784_v18 = vadd.f32 %v1782_v53, %v1774_v17  ;;  %v2040_v17 = vld [vmem:[#allocation5 + $0x6] sm:$0x3]  ;;  %v2074_v53 = vcombine.low %v2041_v13, %v2042_v52 }
0x12b9   :  { %2760 = vtanh.f32 %v1784_v18 }
0x12c3   :  { %v2761_v19 = vpop.eup %2760 }
0x12c4   :  { %1787 = vrot.lane.b32.xlu0 %v2761_v19, %s2921_s3  ;;  %v2031_v19 = vld [vmem:[#allocation4 + $0x4] sm:$0x3] }
0x1327   :  { %v1804_v21 = vpop.permute.xlu1 %1803 }
0x1328   :  { %v1806_v22 = vadd.f32 %v1804_v21, %v1796_v20  ;;  %v2058_v20 = vcombine.low %v2039_v14, %v2040_v17  ;;  %v2044_v21 = vld [vmem:[#allocation5 + $0xe] sm:$0x3] }
0x132a   :  { %2762 = vtanh.f32 %v1806_v22 }
0x1334   :  { %v2763_v23 = vpop.eup %2762 }
0x1335   :  { %1809 = vrot.lane.b32.xlu1 %v2763_v23, %s2921_s3 }
0x1336   :  { %v1788_v24 = vpop.permute.xlu0 %1787 }
0x1337   :  { %v1790_v25 = vmul.f32 %v1788_v24, %v1772_v8  ;;  %v2045_v8 = vld [vmem:[%s3352_s5] sm:$0xff] }
0x1338   :  { %v2656_v11 = vpack.c.bf16 %v2046_v9, %v2045_v8 }
0x1339   :  { %1814 = vrot.lane.b32.xlu0 %v1790_v25, %s2932_s27  ;;  %v2075_v25 = vcombine.low %v2043_v16, %v2044_v21 }
0x13a7   :  { %v1810_v26 = vpop.permute.xlu1 %1809 }
0x13a8   :  { %v1812_v27 = vmul.f32 %v1810_v26, %v1794_v15  ;;  %v2032_v15 = vld [vmem:[#allocation4 + $0x6] sm:$0x3]  ;;  %v2029_v26 = vld [vmem:[#allocation4] sm:$0x3] }
0x13aa   :  { %1820 = vrot.lane.b32.xlu1 %v1812_v27, %s2932_s27 }
0x13ab   :  { %v1815_v28 = vpop.permute.xlu0 %1814 }
0x13ac   :  { %1818 = vst.msk [vmem:[#allocation4 + $0xc] sm:$0x3] %vm581_vm3, %v1815_v28  ;;  %2573 = vmatmul.mubr.msk.f32.vlgmr.msra.gmra.mrb[12].mxu0 %vm385_vm4, %v1815_v28 }
0x13ad   :  { %2655 = vmatpush3.bf16.msra.mxu0 %v2652_v36 }
0x13ae   :  { %348 = vrot.lane.b32.xlu1 %v298_v3, %s2929_s4  ;;  %2657 = vmatprep.subr.bf16.mxu0 %v2656_v11  ;;  %v2082_v3 = vrot.slane %v2074_v53, %v3057_v10 }
0x141c   :  { %v1821_v29 = vpop.permute.xlu1 %1820 }
0x141d   :  { %1824 = vst.msk [vmem:[#allocation5 + $0x2] sm:$0x3] %vm581_vm3, %v1821_v29  ;;  %2580 = vmatmul.mubr.msk.f32.vlgmr.msra.gmra.mrb[18].mxu1 %vm385_vm4, %v1821_v29 }
0x1420   :  { %v349_v30 = vpop.permute.xlu1 %348 }
0x1421   :  { %372 = vst.msk [vmem:[#allocation3] sm:$0x3] %vm283_vm2, %v349_v30  ;;  %v2072_v30 = vrot.slane %v2058_v20, %v3057_v10 }
0x1424   :  { %v2038_v24 = vld [vmem:[#allocation5 + $0x2] sm:$0x3] }
0x1428   :  { %v1900_v48 = vld [vmem:[#allocation3] sm:$0x3] }
0x147f   :  { %v1895_v33 = vpop.f32.mrb[12].mxu0 }
0x1480   :  { %v1899_v34 = vadd.f32 %v1895_v33, %v1826_v32  ;;  %v2574_v35 = vpop.f32.mrb[13].mxu0 }
0x1482   :  { %2764 = vtanh.f32 %v1899_v34  ;;  %v1974_v56 = vmul.f32 0.5, %v1899_v34  ;;  %v2089_v34 = vrot.slane %v2075_v25, %v3057_v10 }
0x1484   :  { %2766 = vtanh.f32 %v1974_v56  ;;  %v2034_v56 = vld [vmem:[#allocation4 + $0xa] sm:$0x3] }
0x148c   :  { %v2765_v37 = vpop.eup %2764 }
0x148d   :  { %1981 = vrot.lane.b32.xlu1 %v2765_v37, %s2930_s16 }
0x148e   :  { %v2767_v41 = vpop.eup %2766 }
0x148f   :  { %v1976_v42 = vmul.f32 0.5, %v2767_v41  ;;  %v2033_v41 = vld [vmem:[#allocation4 + $0x8] sm:$0x3] }
0x1491   :  { %v1977_v44 = vadd.f32 0.5, %v1976_v42  ;;  %v2195_v42 = vcombine.low %v2033_v41, %v2034_v56 }
0x1493   :  { %v1979_v59 = vmul.f32 %v1977_v44, %v1784_v18  ;;  %v2030_v18 = vld [vmem:[#allocation4 + $0x2] sm:$0x3] }
0x1494   :  { %v2178_v28 = vcombine.low %v2029_v26, %v2030_v18 }
0x1496   :  { %v2186_v37 = vrot.slane %v2178_v28, %v3057_v10 }
0x14f0   :  { %v1969_v38 = vpop.f32.mrb[18].mxu1 }
0x14f1   :  { %v1973_v39 = vadd.f32 %v1969_v38, %v1900_v48  ;;  %v2581_v40 = vpop.f32.mrb[19].mxu1  ;;  %v2035_v48 = vld [vmem:[#allocation4 + $0xc] sm:$0x3]  ;;  %v2090_v38 = vcombine.low %v2082_v3, %v2089_v34 }
0x14f3   :  { %2768 = vtanh.f32 %v1973_v39  ;;  %v1996_v49 = vmul.f32 0.5, %v1973_v39 }
0x14f5   :  { %2770 = vtanh.f32 %v1996_v49 }
0x14fd   :  { %v2769_v43 = vpop.eup %2768 }
0x14fe   :  { %2003 = vrot.lane.b32.xlu0 %v2769_v43, %s2930_s16 }
0x14ff   :  { %v1982_v45 = vpop.permute.xlu1 %1981  ;;  %v2771_v50 = vpop.eup %2770 }
0x1500   :  { %v1984_v47 = vmul.f32 %v1982_v45, %v1977_v44  ;;  %v1998_v51 = vmul.f32 0.5, %v2771_v50 }
0x1502   :  { %1986 = vrot.lane.b32.xlu1 %v1984_v47, %s2931_s26  ;;  %v1999_v55 = vadd.f32 0.5, %v1998_v51  ;;  %v2392_v47 = vld [vmem:[%s3354_s7] ss:$0 sm:$0xff]  ;;  %s2886_s7 = scalar_lea.vmem %s2358_s11, 256 }
0x1503   :  { %p2887_p12 = scmp.ne.s32.totalorder %s2358_s11, %s2886_s7  ;;  %p2892_p0 = scmp.lt.s32.totalorder %s2886_s7, %s2886_s7 }
0x1504   :  { %v2001_v31 = vmul.f32 %v1999_v55, %v1806_v22  ;;  %v2179_v22 = vcombine.low %v2031_v19, %v2032_v15 }
0x1505   :  { %p2893_p1 = por %p2892_p0, %p2891_p13 }
0x1506   :  { %v2193_v32 = vrot.slane %v2179_v22, %v3057_v10 }
0x1507   :  { %p2894_p2 = pnand %p2893_p1, %p2887_p12 }
0x1508   :  { %v2194_v40 = vcombine.low %v2186_v37, %v2193_v32 }
0x1570   :  { %v2004_v57 = vpop.permute.xlu0 %2003 }
0x1571   :  { %v2006_v58 = vmul.f32 %v2004_v57, %v1999_v55 }
0x1573   :  { %2008 = vrot.lane.b32.xlu0 %v2006_v58, %s2931_s26 }
0x1574   :  { %v1987_v60 = vpop.permute.xlu1 %1986 }
0x1575   :  { %v1989_v46 = vadd.f32 %v1987_v60, %v1979_v59 }
0x1577   :  { %2772 = vtanh.f32 %v1989_v46 }
0x1581   :  { %v2773_v54 = vpop.eup %2772 }
0x1582   :  { %1992 = vrot.lane.b32.xlu1 %v2773_v54, %s2921_s3 }
0x15e5   :  { %v2009_v61 = vpop.permute.xlu0 %2008 }
0x15e6   :  { %v2011_v62 = vadd.f32 %v2009_v61, %v2001_v31 }
0x15e8   :  { %2774 = vtanh.f32 %v2011_v62 }
0x15f2   :  { %v2775_v63 = vpop.eup %2774 }
0x15f3   :  { %2014 = vrot.lane.b32.xlu0 %v2775_v63, %s2921_s3 }
0x15f4   :  { %v1993_v0 = vpop.permute.xlu1 %1992 }
0x15f5   :  { %v1995_v1 = vmul.f32 %v1993_v0, %v1977_v44  ;;  %v2203_v44 = vrot.slane %v2195_v42, %v3057_v10 }
0x15f7   :  { %2019 = vrot.lane.b32.xlu1 %v1995_v1, %s2932_s27 }
0x1665   :  { %v2015_v6 = vpop.permute.xlu0 %2014 }
0x1666   :  { %v2017_v4 = vmul.f32 %v2015_v6, %v1999_v55 }
0x1668   :  { %2025 = vrot.lane.b32.xlu0 %v2017_v4, %s2932_s27 }
0x1669   :  { %v2020_v7 = vpop.permute.xlu1 %2019 }
0x166a   :  { %2023 = vst.msk [vmem:[#allocation4 + $0xe] sm:$0x3] %vm581_vm3, %v2020_v7 }
0x1671   :  { %v2036_v33 = vld [vmem:[#allocation4 + $0xe] sm:$0x3] }
0x1672   :  { %v2196_v39 = vcombine.low %v2035_v48, %v2036_v33 }
0x1674   :  { %v2210_v43 = vrot.slane %v2196_v39, %v3057_v10 }
0x1676   :  { %v2211_v45 = vcombine.low %v2203_v44, %v2210_v43 }
0x16da   :  { %v2026_v12 = vpop.permute.xlu0 %2025 }
0x16db   :  { %2028 = vst.msk [vmem:[#allocation5] sm:$0x3] %vm581_vm3, %v2026_v12 }
0x16e2   :  { %v2037_v23 = vld [vmem:[#allocation5] sm:$0x3] }
0x16e3   :  { %v2057_v27 = vcombine.low %v2037_v23, %v2038_v24 }
0x16e5   :  { %v2065_v29 = vrot.slane %v2057_v27, %v3057_v10 }
0x16e7   :  { %v2073_v35 = vcombine.low %v2065_v29, %v2072_v30 }
0x16e9   :  { %2586 = vmatprep.mubr.msk.f32.mxu0 %vm385_vm4, %v2073_v35 }
0x16ea   :  { %2587 = vmatmul.mubr.msk.f32.vlgmr.msra.gmra.mrb[14].mxu0 %vm385_vm4, %v2090_v38 }
0x16eb   :  { %2659 = vmatpush3.bf16.msra.mxu0 %v2656_v11  ;;  %2593 = vmatprep.mubr.msk.f32.mxu0 %vm385_vm4, %v2194_v40 }
0x16f2   :  { %2594 = vmatmul.mubr.msk.f32.vlgmr.msra.gmra.mrb[14].mxu0 %vm385_vm4, %v2211_v45 }
0x17c5   :  { %v2595_v49 = vpop.f32.mrb[14].mxu0 }
0x17c6   :  { %v2299_v50 = vadd.f32 %v2595_v49, %v2392_v47  ;;  %v2282_v51 = vpop.f32.mrb[15].mxu0 }
0x17c7   :  { %v2298_v55 = vadd.f32 %v2392_v47, %v2282_v51 }
0x17c8   :  { %v2319_v57 = vcombine.high %v2299_v50, %v2299_v50  ;;  %v2326_v58 = vrot.slane %v2299_v50, %v3057_v10  ;;  %2395 = vst.sshfl [vmem:[#allocation15 + $0x8] sm:$0x3 pattern:$0x76325410] %v2299_v50 }
0x17c9   :  { %v2302_v59 = vcombine.high %v2298_v55, %v2298_v55  ;;  %v2309_v60 = vrot.slane %v2298_v55, %v3057_v10  ;;  %2393 = vst.sshfl [vmem:[#allocation15] sm:$0x3 pattern:$0x76325410] %v2298_v55 }
0x17ca   :  { %v2333_v46 = vrot.slane %v2319_v57, %v3057_v10  ;;  %v2334_v54 = vcombine.high %v2326_v58, %v2326_v58  ;;  %2396 = vst.sshfl [vmem:[#allocation15 + $0xc] sm:$0x3 pattern:$0x76325410] %v2319_v57 }
0x17cb   :  { %v2316_v31 = vrot.slane %v2302_v59, %v3057_v10  ;;  %v2317_v61 = vcombine.high %v2309_v60, %v2309_v60  ;;  %2394 = vst.sshfl [vmem:[#allocation15 + $0x4] sm:$0x3 pattern:$0x76325410] %v2302_v59 }
0x17cc   :  { %v2335_v62 = vcombine.high %v2333_v46, %v2333_v46  ;;  %2349 = vst [vmem:[#allocation15 + $0xa] sm:$0x3] %v2334_v54 }
0x17cd   :  { %v2318_v63 = vcombine.high %v2316_v31, %v2316_v31  ;;  %2345 = vst [vmem:[#allocation15 + $0x2] sm:$0x3] %v2317_v61 }
0x17ce   :  { %2351 = vst [vmem:[#allocation15 + $0xe] sm:$0x3] %v2335_v62 }
0x17cf   :  { %2347 = vst [vmem:[#allocation15 + $0x6] sm:$0x3] %v2318_v63 }
0x17d0   :  { %2897 = shalt.err (!%p2894_p2)
}
0x17d1   :  { %s2898_s12 = scalar_lea.hbm %s3355_s8, 256 }
0x17d2   :  { %p2899_p3 = scmp.ne.s32.totalorder %s3355_s8, %s2898_s12  ;;  %p2902_p4 = scmp.lt.u32.totalorder %s2898_s12, %s3355_s8 }
0x17d4   :  { %p2904_p5 = pnand %p2902_p4, %p2899_p3 }
0x17d6   :  { %2907 = shalt.err (!%p2904_p5)
}
0x17d7   :  { %2363 = dma.vmem_to_hbm [thread:$0]  %s2358_s11, 256, %s3355_s8, [#allocation8], %s2921_s3, %s2921_s3, %s2922_s20  }
0x17d8   :  { %2914 = dma.done.wait [#allocation8], 256  }
0x17d9   :  { %2915 = vsyncadd [#allocation8], 4294967040 }
0x17da   :  { %2367 = vsyncpa [#allocation7], 1 }
0x17db   :  { %2368 = vsyncpa [#allocation10], 1 }
0x17dc   :  { %2369 = vsyncpa [#allocation13], 1 }
0x17dd   :  { %2370 = vsyncpa [#allocation8], 1 }

</bundles_post_ra>
